<compile_context>
chip_gen: v5e
topology: v5e:2x2
jax: 0.10.0
libtpu: 0.0.40
codegen_flags: <defaults>
</compile_context>

<pallas_src>
import functools

import jax
import jax.numpy as jnp
from jax import lax
from jax.experimental import pallas as pl
from jax.experimental.pallas import tpu as pltpu

_LANE = 128                          # TPU lane width
_TB_CAP = 4096                       # absolute cap on batch-tile lanes
_VMEM_BUDGET = 16 * 1024 * 1024      # target live working set per grid step
_LIVE_SLABS = 10                     # ~#concurrent (tb, n_assets) f32 arrays:
                                     #  2x dbl-buffered in + 2x out + z + z.T + kary temps
_VMEM_LIMIT_BYTES = 48 * 1024 * 1024 # < v7x 64 MiB physical, >> v5e 16 MiB default


def _round_up(v, m):
    return -(-v // m) * m


def _pick_batch_tile(n_samples, n_assets):
    """Batch-tile (lanes) that is VMEM-aware and keeps >=2 grid steps for v7x."""
    bp = max(_LANE, _round_up(n_samples, _LANE))
    # VMEM budget: keep ~_LIVE_SLABS live f32 copies of the (tb, n_assets) tile.
    bytes_per_row = max(1, n_assets) * 4 * _LIVE_SLABS
    tb_vmem = max(_LANE, (_VMEM_BUDGET // bytes_per_row) // _LANE * _LANE)
    # Megacore: >= 2 grid steps whenever the batch spans >= 2 lane tiles.
    tb_core = _round_up(max(_LANE, bp // 2), _LANE) if bp >= 2 * _LANE else _LANE
    return int(max(_LANE, min(_TB_CAP, tb_vmem, tb_core, bp)))


def _sparsemax_kernel(x_ref, t_ref, o_ref, *, max_weight, n_kary, n_newton):
    """Capped-simplex projection of x / t for one batch tile.

    x_ref : (tb, n_assets)   native HBM layout
    t_ref : (tb, 1)
    o_ref : (tb, n_assets)
    """
    x = x_ref[...].astype(jnp.float32)                  # (tb, A)
    t = t_ref[...].astype(jnp.float32)                  # (tb, 1)
    z_bt = x / t                                        # exact division (faithful z)

    # Lane-dense compute layout: assets on sublanes, batch on lanes (tb % 128 == 0).
    # One XLU transpose in, one out -- cheap relative to the ~30 VALU passes below.
    z = z_bt.T                                          # (A, tb)

    mw = jnp.float32(max_weight)
    one = jnp.float32(1.0)

    def fsum(tau):
        return jnp.sum(jnp.clip(z - tau, 0.0, mw), axis=0, keepdims=True)

    # Bracket for tau:  f(lo) >= 0 > f(hi).
    hi = jnp.max(z, axis=0, keepdims=True)              # f(hi) = -1 < 0
    if max_weight >= 1.0:
        # Top asset alone contributes clip(1, 0, mw) = 1 at tau = max(z) - 1,
        # so this is a valid lower bound with data-independent width 1.
        lo = hi - one
    else:
        # z_i - lo >= mw for all i, so f(lo) = n_assets*mw - 1 >= 0 (checked in wrapper).
        lo = jnp.min(z, axis=0, keepdims=True) - mw
    width = hi - lo

    # Phase 1: 4-ary section search. The 3 candidate sums are data-independent,
    # so their sublane reductions overlap on the XLU; each step shrinks 4x.
    def kary_body(_, carry):
        lo, width = carry
        q = 0.25 * width
        c = ((fsum(lo + q) > one).astype(jnp.float32)
             + (fsum(lo + 2.0 * q) > one).astype(jnp.float32)
             + (fsum(lo + 3.0 * q) > one).astype(jnp.float32))
        return lo + q * c, q

    lo, width = lax.fori_loop(0, n_kary, kary_body, (lo, width), unroll=True)
    hi = lo + width
    tau = lo + 0.5 * width

    # Phase 2: safeguarded Newton. f is piecewise linear with slope -#active,
    # so once the bracket contains a single linear piece one step is exact;
    # clamping to the (still-updated) bracket keeps the worst case bounded.
    def newton_body(_, carry):
        tau, lo, hi = carry
        d = z - tau
        s = jnp.sum(jnp.clip(d, 0.0, mw), axis=0, keepdims=True)
        active = jnp.sum(jnp.logical_and(d > 0.0, d < mw).astype(jnp.float32),
                         axis=0, keepdims=True)
        go_right = s > one
        lo = jnp.where(go_right, tau, lo)
        hi = jnp.where(go_right, hi, tau)
        tau = jnp.clip(tau + (s - one) / jnp.maximum(active, one), lo, hi)
        return tau, lo, hi

    tau, _, _ = lax.fori_loop(0, n_newton, newton_body, (tau, lo, hi),
                              unroll=True)

    w = jnp.clip(z - tau, 0.0, mw)                      # (A, tb)
    o_ref[...] = w.T.astype(o_ref.dtype)                # back to native layout


def sparsemax_allocator_forward(x, temperature=None, *, default_temperature=1.0,
                                max_weight=1.0, n_kary=8, n_newton=3):
    """JAX/Pallas equivalent of SparsemaxAllocator.forward.

    x : (n_samples, n_assets)
    temperature : None or (n_samples,) array; if None uses default_temperature.
    Returns weights of shape (n_samples, n_assets).
    """
    x = jnp.asarray(x)
    n_samples, n_assets = x.shape
    if n_assets * max_weight < 1:
        raise ValueError(
            'One cannot create fully invested portfolio with the given max_weight')

    if temperature is None:
        t = jnp.full((n_samples, 1), float(default_temperature), dtype=x.dtype)
    else:
        t = jnp.asarray(temperature).astype(x.dtype).reshape(n_samples, 1)

    tb = _pick_batch_tile(n_samples, n_assets)
    grid = (pl.cdiv(n_samples, tb),)

    kernel = functools.partial(_sparsemax_kernel, max_weight=float(max_weight),
                               n_kary=int(n_kary), n_newton=int(n_newton))

    # ~3 VALU ops per element per pass; 3 evals/kary step, ~2 passes/newton step,
    # plus divide / transposes / final clip.
    n_passes = 3 * n_kary + 2 * n_newton + 6
    itemsize = jnp.dtype(x.dtype).itemsize
    cost = pl.CostEstimate(
        flops=int(3 * n_passes * n_samples * n_assets),
        transcendentals=0,
        bytes_accessed=int(2 * n_samples * n_assets * itemsize + n_samples * itemsize),
    )

    return pl.pallas_call(
        kernel,
        out_shape=jax.ShapeDtypeStruct((n_samples, n_assets), x.dtype),
        grid=grid,
        in_specs=[
            pl.BlockSpec((tb, n_assets), lambda i: (i, 0)),
            pl.BlockSpec((tb, 1), lambda i: (i, 0)),
        ],
        out_specs=pl.BlockSpec((tb, n_assets), lambda i: (i, 0)),
        compiler_params=pltpu.CompilerParams(
            dimension_semantics=("parallel",),
            vmem_limit_bytes=_VMEM_LIMIT_BYTES),
        cost_estimate=cost,
    )(x, t)


def _reference_sparsemax(x, t, max_weight, n_iters=60):
    """Pure-JAX reference (exact division + plain bisection)."""
    z = x.astype(jnp.float32) / t.astype(jnp.float32)[:, None]
    lo = jnp.min(z, axis=-1, keepdims=True) - max_weight
    hi = jnp.max(z, axis=-1, keepdims=True)
    for _ in range(n_iters):
        mid = 0.5 * (lo + hi)
        s = jnp.sum(jnp.clip(z - mid, 0.0, max_weight), axis=-1, keepdims=True)
        go = s > 1.0
        lo = jnp.where(go, mid, lo)
        hi = jnp.where(go, hi, mid)
    tau = 0.5 * (lo + hi)
    return jnp.clip(z - tau, 0.0, max_weight)


if __name__ == "__main__":
    key = jax.random.PRNGKey(0)
    n_samples, n_assets = 8, 16
    kx, kt = jax.random.split(key)
    x = jax.random.normal(kx, (n_samples, n_assets), dtype=jnp.float32)

    # Case 1: constructor temperature=1, max_weight=1 (plain sparsemax).
    w1 = sparsemax_allocator_forward(x, default_temperature=1.0, max_weight=1.0)
    jax.block_until_ready(w1)

    # Case 2: per-sample temperature + capped max_weight.
    temp = 0.5 + jax.random.uniform(kt, (n_samples,), dtype=jnp.float32)
    w2 = sparsemax_allocator_forward(x, temperature=temp, max_weight=0.25)
    jax.block_until_ready(w2)

    # QP constraint checks.
    assert jnp.allclose(jnp.sum(w1, axis=-1), 1.0, atol=5e-4)
    assert jnp.all(w1 >= -1e-6) and jnp.all(w1 <= 1.0 + 1e-6)
    assert jnp.allclose(jnp.sum(w2, axis=-1), 1.0, atol=5e-4)
    assert jnp.all(w2 >= -1e-6) and jnp.all(w2 <= 0.25 + 1e-6)

    # Reference comparison (exact division in both -> tight tolerance).
    ones = jnp.ones((n_samples,), dtype=jnp.float32)
    assert jnp.allclose(w1, _reference_sparsemax(x, ones, 1.0), atol=1e-3)
    assert jnp.allclose(w2, _reference_sparsemax(x, temp, 0.25), atol=1e-3)

    print("KERNEL_OK")
</pallas_src>

<mosaic_0001>
module attributes {stable_mosaic.version = 11 : i64} {
  func.func @_sparsemax_kernel(%arg0: i32, %arg1: memref<128x16xf32, #tpu.memory_space<vmem>>, %arg2: memref<128x1xf32, #tpu.memory_space<vmem>>, %arg3: memref<128x16xf32, #tpu.memory_space<vmem>>) attributes {dimension_semantics = [#tpu.dimension_semantics<parallel>], iteration_bounds = array<i64: 1>, scalar_prefetch = 0 : i64, scratch_operands = 0 : i64, tpu.core_type = #tpu.core_type<tc>, window_params = [{transform_indices = @transform_0, window_bounds = array<i64: 128, 16>}, {transform_indices = @transform_1, window_bounds = array<i64: 128, 1>}, {transform_indices = @transform_2, window_bounds = array<i64: 128, 16>}]} {
    %c0 = arith.constant 0 : index
    %c0_0 = arith.constant 0 : index
    %0 = vector.load %arg1[%c0, %c0_0] : memref<128x16xf32, #tpu.memory_space<vmem>>, vector<128x16xf32>
    %c0_1 = arith.constant 0 : index
    %c0_2 = arith.constant 0 : index
    %1 = vector.load %arg2[%c0_1, %c0_2] : memref<128x1xf32, #tpu.memory_space<vmem>>, vector<128x1xf32>
    %2 = vector.broadcast %1 : vector<128x1xf32> to vector<128x16xf32>
    %3 = arith.divf %0, %2 : vector<128x16xf32>
    %4 = tpu.transpose %3, [1, 0] : vector<128x16xf32> -> vector<16x128xf32>
    %cst = arith.constant dense<0xFF800000> : vector<128xf32>
    %5 = vector.multi_reduction <maximumf>, %4, %cst [0] : vector<16x128xf32> to vector<128xf32>
    %6 = vector.shape_cast %5 : vector<128xf32> to vector<1x128xf32>
    %cst_3 = arith.constant 1.000000e+00 : f32
    %7 = vector.broadcast %cst_3 : f32 to vector<1x128xf32>
    %8 = arith.subf %6, %7 : vector<1x128xf32>
    %9 = arith.subf %6, %8 : vector<1x128xf32>
    %cst_4 = arith.constant 1.000000e+00 : f32
    %cst_5 = arith.constant 1.000000e+00 : f32
    %c0_i32 = arith.constant 0 : i32
    %cst_6 = arith.constant 2.500000e-01 : f32
    %10 = vector.broadcast %cst_6 : f32 to vector<1x128xf32>
    %11 = arith.mulf %10, %9 : vector<1x128xf32>
    %12 = arith.addf %8, %11 : vector<1x128xf32>
    %13 = vector.broadcast %12 : vector<1x128xf32> to vector<16x128xf32>
    %14 = arith.subf %4, %13 : vector<16x128xf32>
    %cst_7 = arith.constant 0.000000e+00 : f32
    %15 = vector.broadcast %cst_7 : f32 to vector<16x128xf32>
    %16 = arith.maximumf %15, %14 : vector<16x128xf32>
    %17 = vector.broadcast %cst_4 : f32 to vector<16x128xf32>
    %18 = arith.minimumf %17, %16 : vector<16x128xf32>
    %cst_8 = arith.constant dense<0.000000e+00> : vector<128xf32>
    %19 = vector.multi_reduction <add>, %18, %cst_8 [0] : vector<16x128xf32> to vector<128xf32>
    %20 = vector.shape_cast %19 : vector<128xf32> to vector<1x128xf32>
    %21 = vector.broadcast %cst_5 : f32 to vector<1x128xf32>
    %22 = arith.cmpf ogt, %20, %21 : vector<1x128xf32>
    %23 = arith.extui %22 : vector<1x128xi1> to vector<1x128xi32>
    %24 = arith.sitofp %23 : vector<1x128xi32> to vector<1x128xf32>
    %cst_9 = arith.constant 2.000000e+00 : f32
    %25 = vector.broadcast %cst_9 : f32 to vector<1x128xf32>
    %26 = arith.mulf %25, %11 : vector<1x128xf32>
    %27 = arith.addf %8, %26 : vector<1x128xf32>
    %28 = vector.broadcast %27 : vector<1x128xf32> to vector<16x128xf32>
    %29 = arith.subf %4, %28 : vector<16x128xf32>
    %cst_10 = arith.constant 0.000000e+00 : f32
    %30 = vector.broadcast %cst_10 : f32 to vector<16x128xf32>
    %31 = arith.maximumf %30, %29 : vector<16x128xf32>
    %32 = vector.broadcast %cst_4 : f32 to vector<16x128xf32>
    %33 = arith.minimumf %32, %31 : vector<16x128xf32>
    %cst_11 = arith.constant dense<0.000000e+00> : vector<128xf32>
    %34 = vector.multi_reduction <add>, %33, %cst_11 [0] : vector<16x128xf32> to vector<128xf32>
    %35 = vector.shape_cast %34 : vector<128xf32> to vector<1x128xf32>
    %36 = vector.broadcast %cst_5 : f32 to vector<1x128xf32>
    %37 = arith.cmpf ogt, %35, %36 : vector<1x128xf32>
    %38 = arith.extui %37 : vector<1x128xi1> to vector<1x128xi32>
    %39 = arith.sitofp %38 : vector<1x128xi32> to vector<1x128xf32>
    %40 = arith.addf %24, %39 : vector<1x128xf32>
    %cst_12 = arith.constant 3.000000e+00 : f32
    %41 = vector.broadcast %cst_12 : f32 to vector<1x128xf32>
    %42 = arith.mulf %41, %11 : vector<1x128xf32>
    %43 = arith.addf %8, %42 : vector<1x128xf32>
    %44 = vector.broadcast %43 : vector<1x128xf32> to vector<16x128xf32>
    %45 = arith.subf %4, %44 : vector<16x128xf32>
    %cst_13 = arith.constant 0.000000e+00 : f32
    %46 = vector.broadcast %cst_13 : f32 to vector<16x128xf32>
    %47 = arith.maximumf %46, %45 : vector<16x128xf32>
    %48 = vector.broadcast %cst_4 : f32 to vector<16x128xf32>
    %49 = arith.minimumf %48, %47 : vector<16x128xf32>
    %cst_14 = arith.constant dense<0.000000e+00> : vector<128xf32>
    %50 = vector.multi_reduction <add>, %49, %cst_14 [0] : vector<16x128xf32> to vector<128xf32>
    %51 = vector.shape_cast %50 : vector<128xf32> to vector<1x128xf32>
    %52 = vector.broadcast %cst_5 : f32 to vector<1x128xf32>
    %53 = arith.cmpf ogt, %51, %52 : vector<1x128xf32>
    %54 = arith.extui %53 : vector<1x128xi1> to vector<1x128xi32>
    %55 = arith.sitofp %54 : vector<1x128xi32> to vector<1x128xf32>
    %56 = arith.addf %40, %55 : vector<1x128xf32>
    %57 = arith.mulf %11, %56 : vector<1x128xf32>
    %58 = arith.addf %8, %57 : vector<1x128xf32>
    %c1_i32 = arith.constant 1 : i32
    %cst_15 = arith.constant 2.500000e-01 : f32
    %59 = vector.broadcast %cst_15 : f32 to vector<1x128xf32>
    %60 = arith.mulf %59, %11 : vector<1x128xf32>
    %61 = arith.addf %58, %60 : vector<1x128xf32>
    %62 = vector.broadcast %61 : vector<1x128xf32> to vector<16x128xf32>
    %63 = arith.subf %4, %62 : vector<16x128xf32>
    %cst_16 = arith.constant 0.000000e+00 : f32
    %64 = vector.broadcast %cst_16 : f32 to vector<16x128xf32>
    %65 = arith.maximumf %64, %63 : vector<16x128xf32>
    %66 = vector.broadcast %cst_4 : f32 to vector<16x128xf32>
    %67 = arith.minimumf %66, %65 : vector<16x128xf32>
    %cst_17 = arith.constant dense<0.000000e+00> : vector<128xf32>
    %68 = vector.multi_reduction <add>, %67, %cst_17 [0] : vector<16x128xf32> to vector<128xf32>
    %69 = vector.shape_cast %68 : vector<128xf32> to vector<1x128xf32>
    %70 = vector.broadcast %cst_5 : f32 to vector<1x128xf32>
    %71 = arith.cmpf ogt, %69, %70 : vector<1x128xf32>
    %72 = arith.extui %71 : vector<1x128xi1> to vector<1x128xi32>
    %73 = arith.sitofp %72 : vector<1x128xi32> to vector<1x128xf32>
    %cst_18 = arith.constant 2.000000e+00 : f32
    %74 = vector.broadcast %cst_18 : f32 to vector<1x128xf32>
    %75 = arith.mulf %74, %60 : vector<1x128xf32>
    %76 = arith.addf %58, %75 : vector<1x128xf32>
    %77 = vector.broadcast %76 : vector<1x128xf32> to vector<16x128xf32>
    %78 = arith.subf %4, %77 : vector<16x128xf32>
    %cst_19 = arith.constant 0.000000e+00 : f32
    %79 = vector.broadcast %cst_19 : f32 to vector<16x128xf32>
    %80 = arith.maximumf %79, %78 : vector<16x128xf32>
    %81 = vector.broadcast %cst_4 : f32 to vector<16x128xf32>
    %82 = arith.minimumf %81, %80 : vector<16x128xf32>
    %cst_20 = arith.constant dense<0.000000e+00> : vector<128xf32>
    %83 = vector.multi_reduction <add>, %82, %cst_20 [0] : vector<16x128xf32> to vector<128xf32>
    %84 = vector.shape_cast %83 : vector<128xf32> to vector<1x128xf32>
    %85 = vector.broadcast %cst_5 : f32 to vector<1x128xf32>
    %86 = arith.cmpf ogt, %84, %85 : vector<1x128xf32>
    %87 = arith.extui %86 : vector<1x128xi1> to vector<1x128xi32>
    %88 = arith.sitofp %87 : vector<1x128xi32> to vector<1x128xf32>
    %89 = arith.addf %73, %88 : vector<1x128xf32>
    %cst_21 = arith.constant 3.000000e+00 : f32
    %90 = vector.broadcast %cst_21 : f32 to vector<1x128xf32>
    %91 = arith.mulf %90, %60 : vector<1x128xf32>
    %92 = arith.addf %58, %91 : vector<1x128xf32>
    %93 = vector.broadcast %92 : vector<1x128xf32> to vector<16x128xf32>
    %94 = arith.subf %4, %93 : vector<16x128xf32>
    %cst_22 = arith.constant 0.000000e+00 : f32
    %95 = vector.broadcast %cst_22 : f32 to vector<16x128xf32>
    %96 = arith.maximumf %95, %94 : vector<16x128xf32>
    %97 = vector.broadcast %cst_4 : f32 to vector<16x128xf32>
    %98 = arith.minimumf %97, %96 : vector<16x128xf32>
    %cst_23 = arith.constant dense<0.000000e+00> : vector<128xf32>
    %99 = vector.multi_reduction <add>, %98, %cst_23 [0] : vector<16x128xf32> to vector<128xf32>
    %100 = vector.shape_cast %99 : vector<128xf32> to vector<1x128xf32>
    %101 = vector.broadcast %cst_5 : f32 to vector<1x128xf32>
    %102 = arith.cmpf ogt, %100, %101 : vector<1x128xf32>
    %103 = arith.extui %102 : vector<1x128xi1> to vector<1x128xi32>
    %104 = arith.sitofp %103 : vector<1x128xi32> to vector<1x128xf32>
    %105 = arith.addf %89, %104 : vector<1x128xf32>
    %106 = arith.mulf %60, %105 : vector<1x128xf32>
    %107 = arith.addf %58, %106 : vector<1x128xf32>
    %c2_i32 = arith.constant 2 : i32
    %cst_24 = arith.constant 2.500000e-01 : f32
    %108 = vector.broadcast %cst_24 : f32 to vector<1x128xf32>
    %109 = arith.mulf %108, %60 : vector<1x128xf32>
    %110 = arith.addf %107, %109 : vector<1x128xf32>
    %111 = vector.broadcast %110 : vector<1x128xf32> to vector<16x128xf32>
    %112 = arith.subf %4, %111 : vector<16x128xf32>
    %cst_25 = arith.constant 0.000000e+00 : f32
    %113 = vector.broadcast %cst_25 : f32 to vector<16x128xf32>
    %114 = arith.maximumf %113, %112 : vector<16x128xf32>
    %115 = vector.broadcast %cst_4 : f32 to vector<16x128xf32>
    %116 = arith.minimumf %115, %114 : vector<16x128xf32>
    %cst_26 = arith.constant dense<0.000000e+00> : vector<128xf32>
    %117 = vector.multi_reduction <add>, %116, %cst_26 [0] : vector<16x128xf32> to vector<128xf32>
    %118 = vector.shape_cast %117 : vector<128xf32> to vector<1x128xf32>
    %119 = vector.broadcast %cst_5 : f32 to vector<1x128xf32>
    %120 = arith.cmpf ogt, %118, %119 : vector<1x128xf32>
    %121 = arith.extui %120 : vector<1x128xi1> to vector<1x128xi32>
    %122 = arith.sitofp %121 : vector<1x128xi32> to vector<1x128xf32>
    %cst_27 = arith.constant 2.000000e+00 : f32
    %123 = vector.broadcast %cst_27 : f32 to vector<1x128xf32>
    %124 = arith.mulf %123, %109 : vector<1x128xf32>
    %125 = arith.addf %107, %124 : vector<1x128xf32>
    %126 = vector.broadcast %125 : vector<1x128xf32> to vector<16x128xf32>
    %127 = arith.subf %4, %126 : vector<16x128xf32>
    %cst_28 = arith.constant 0.000000e+00 : f32
    %128 = vector.broadcast %cst_28 : f32 to vector<16x128xf32>
    %129 = arith.maximumf %128, %127 : vector<16x128xf32>
    %130 = vector.broadcast %cst_4 : f32 to vector<16x128xf32>
    %131 = arith.minimumf %130, %129 : vector<16x128xf32>
    %cst_29 = arith.constant dense<0.000000e+00> : vector<128xf32>
    %132 = vector.multi_reduction <add>, %131, %cst_29 [0] : vector<16x128xf32> to vector<128xf32>
    %133 = vector.shape_cast %132 : vector<128xf32> to vector<1x128xf32>
    %134 = vector.broadcast %cst_5 : f32 to vector<1x128xf32>
    %135 = arith.cmpf ogt, %133, %134 : vector<1x128xf32>
    %136 = arith.extui %135 : vector<1x128xi1> to vector<1x128xi32>
    %137 = arith.sitofp %136 : vector<1x128xi32> to vector<1x128xf32>
    %138 = arith.addf %122, %137 : vector<1x128xf32>
    %cst_30 = arith.constant 3.000000e+00 : f32
    %139 = vector.broadcast %cst_30 : f32 to vector<1x128xf32>
    %140 = arith.mulf %139, %109 : vector<1x128xf32>
    %141 = arith.addf %107, %140 : vector<1x128xf32>
    %142 = vector.broadcast %141 : vector<1x128xf32> to vector<16x128xf32>
    %143 = arith.subf %4, %142 : vector<16x128xf32>
    %cst_31 = arith.constant 0.000000e+00 : f32
    %144 = vector.broadcast %cst_31 : f32 to vector<16x128xf32>
    %145 = arith.maximumf %144, %143 : vector<16x128xf32>
    %146 = vector.broadcast %cst_4 : f32 to vector<16x128xf32>
    %147 = arith.minimumf %146, %145 : vector<16x128xf32>
    %cst_32 = arith.constant dense<0.000000e+00> : vector<128xf32>
    %148 = vector.multi_reduction <add>, %147, %cst_32 [0] : vector<16x128xf32> to vector<128xf32>
    %149 = vector.shape_cast %148 : vector<128xf32> to vector<1x128xf32>
    %150 = vector.broadcast %cst_5 : f32 to vector<1x128xf32>
    %151 = arith.cmpf ogt, %149, %150 : vector<1x128xf32>
    %152 = arith.extui %151 : vector<1x128xi1> to vector<1x128xi32>
    %153 = arith.sitofp %152 : vector<1x128xi32> to vector<1x128xf32>
    %154 = arith.addf %138, %153 : vector<1x128xf32>
    %155 = arith.mulf %109, %154 : vector<1x128xf32>
    %156 = arith.addf %107, %155 : vector<1x128xf32>
    %c3_i32 = arith.constant 3 : i32
    %cst_33 = arith.constant 2.500000e-01 : f32
    %157 = vector.broadcast %cst_33 : f32 to vector<1x128xf32>
    %158 = arith.mulf %157, %109 : vector<1x128xf32>
    %159 = arith.addf %156, %158 : vector<1x128xf32>
    %160 = vector.broadcast %159 : vector<1x128xf32> to vector<16x128xf32>
    %161 = arith.subf %4, %160 : vector<16x128xf32>
    %cst_34 = arith.constant 0.000000e+00 : f32
    %162 = vector.broadcast %cst_34 : f32 to vector<16x128xf32>
    %163 = arith.maximumf %162, %161 : vector<16x128xf32>
    %164 = vector.broadcast %cst_4 : f32 to vector<16x128xf32>
    %165 = arith.minimumf %164, %163 : vector<16x128xf32>
    %cst_35 = arith.constant dense<0.000000e+00> : vector<128xf32>
    %166 = vector.multi_reduction <add>, %165, %cst_35 [0] : vector<16x128xf32> to vector<128xf32>
    %167 = vector.shape_cast %166 : vector<128xf32> to vector<1x128xf32>
    %168 = vector.broadcast %cst_5 : f32 to vector<1x128xf32>
    %169 = arith.cmpf ogt, %167, %168 : vector<1x128xf32>
    %170 = arith.extui %169 : vector<1x128xi1> to vector<1x128xi32>
    %171 = arith.sitofp %170 : vector<1x128xi32> to vector<1x128xf32>
    %cst_36 = arith.constant 2.000000e+00 : f32
    %172 = vector.broadcast %cst_36 : f32 to vector<1x128xf32>
    %173 = arith.mulf %172, %158 : vector<1x128xf32>
    %174 = arith.addf %156, %173 : vector<1x128xf32>
    %175 = vector.broadcast %174 : vector<1x128xf32> to vector<16x128xf32>
    %176 = arith.subf %4, %175 : vector<16x128xf32>
    %cst_37 = arith.constant 0.000000e+00 : f32
    %177 = vector.broadcast %cst_37 : f32 to vector<16x128xf32>
    %178 = arith.maximumf %177, %176 : vector<16x128xf32>
    %179 = vector.broadcast %cst_4 : f32 to vector<16x128xf32>
    %180 = arith.minimumf %179, %178 : vector<16x128xf32>
    %cst_38 = arith.constant dense<0.000000e+00> : vector<128xf32>
    %181 = vector.multi_reduction <add>, %180, %cst_38 [0] : vector<16x128xf32> to vector<128xf32>
    %182 = vector.shape_cast %181 : vector<128xf32> to vector<1x128xf32>
    %183 = vector.broadcast %cst_5 : f32 to vector<1x128xf32>
    %184 = arith.cmpf ogt, %182, %183 : vector<1x128xf32>
    %185 = arith.extui %184 : vector<1x128xi1> to vector<1x128xi32>
    %186 = arith.sitofp %185 : vector<1x128xi32> to vector<1x128xf32>
    %187 = arith.addf %171, %186 : vector<1x128xf32>
    %cst_39 = arith.constant 3.000000e+00 : f32
    %188 = vector.broadcast %cst_39 : f32 to vector<1x128xf32>
    %189 = arith.mulf %188, %158 : vector<1x128xf32>
    %190 = arith.addf %156, %189 : vector<1x128xf32>
    %191 = vector.broadcast %190 : vector<1x128xf32> to vector<16x128xf32>
    %192 = arith.subf %4, %191 : vector<16x128xf32>
    %cst_40 = arith.constant 0.000000e+00 : f32
    %193 = vector.broadcast %cst_40 : f32 to vector<16x128xf32>
    %194 = arith.maximumf %193, %192 : vector<16x128xf32>
    %195 = vector.broadcast %cst_4 : f32 to vector<16x128xf32>
    %196 = arith.minimumf %195, %194 : vector<16x128xf32>
    %cst_41 = arith.constant dense<0.000000e+00> : vector<128xf32>
    %197 = vector.multi_reduction <add>, %196, %cst_41 [0] : vector<16x128xf32> to vector<128xf32>
    %198 = vector.shape_cast %197 : vector<128xf32> to vector<1x128xf32>
    %199 = vector.broadcast %cst_5 : f32 to vector<1x128xf32>
    %200 = arith.cmpf ogt, %198, %199 : vector<1x128xf32>
    %201 = arith.extui %200 : vector<1x128xi1> to vector<1x128xi32>
    %202 = arith.sitofp %201 : vector<1x128xi32> to vector<1x128xf32>
    %203 = arith.addf %187, %202 : vector<1x128xf32>
    %204 = arith.mulf %158, %203 : vector<1x128xf32>
    %205 = arith.addf %156, %204 : vector<1x128xf32>
    %c4_i32 = arith.constant 4 : i32
    %cst_42 = arith.constant 2.500000e-01 : f32
    %206 = vector.broadcast %cst_42 : f32 to vector<1x128xf32>
    %207 = arith.mulf %206, %158 : vector<1x128xf32>
    %208 = arith.addf %205, %207 : vector<1x128xf32>
    %209 = vector.broadcast %208 : vector<1x128xf32> to vector<16x128xf32>
    %210 = arith.subf %4, %209 : vector<16x128xf32>
    %cst_43 = arith.constant 0.000000e+00 : f32
    %211 = vector.broadcast %cst_43 : f32 to vector<16x128xf32>
    %212 = arith.maximumf %211, %210 : vector<16x128xf32>
    %213 = vector.broadcast %cst_4 : f32 to vector<16x128xf32>
    %214 = arith.minimumf %213, %212 : vector<16x128xf32>
    %cst_44 = arith.constant dense<0.000000e+00> : vector<128xf32>
    %215 = vector.multi_reduction <add>, %214, %cst_44 [0] : vector<16x128xf32> to vector<128xf32>
    %216 = vector.shape_cast %215 : vector<128xf32> to vector<1x128xf32>
    %217 = vector.broadcast %cst_5 : f32 to vector<1x128xf32>
    %218 = arith.cmpf ogt, %216, %217 : vector<1x128xf32>
    %219 = arith.extui %218 : vector<1x128xi1> to vector<1x128xi32>
    %220 = arith.sitofp %219 : vector<1x128xi32> to vector<1x128xf32>
    %cst_45 = arith.constant 2.000000e+00 : f32
    %221 = vector.broadcast %cst_45 : f32 to vector<1x128xf32>
    %222 = arith.mulf %221, %207 : vector<1x128xf32>
    %223 = arith.addf %205, %222 : vector<1x128xf32>
    %224 = vector.broadcast %223 : vector<1x128xf32> to vector<16x128xf32>
    %225 = arith.subf %4, %224 : vector<16x128xf32>
    %cst_46 = arith.constant 0.000000e+00 : f32
    %226 = vector.broadcast %cst_46 : f32 to vector<16x128xf32>
    %227 = arith.maximumf %226, %225 : vector<16x128xf32>
    %228 = vector.broadcast %cst_4 : f32 to vector<16x128xf32>
    %229 = arith.minimumf %228, %227 : vector<16x128xf32>
    %cst_47 = arith.constant dense<0.000000e+00> : vector<128xf32>
    %230 = vector.multi_reduction <add>, %229, %cst_47 [0] : vector<16x128xf32> to vector<128xf32>
    %231 = vector.shape_cast %230 : vector<128xf32> to vector<1x128xf32>
    %232 = vector.broadcast %cst_5 : f32 to vector<1x128xf32>
    %233 = arith.cmpf ogt, %231, %232 : vector<1x128xf32>
    %234 = arith.extui %233 : vector<1x128xi1> to vector<1x128xi32>
    %235 = arith.sitofp %234 : vector<1x128xi32> to vector<1x128xf32>
    %236 = arith.addf %220, %235 : vector<1x128xf32>
    %cst_48 = arith.constant 3.000000e+00 : f32
    %237 = vector.broadcast %cst_48 : f32 to vector<1x128xf32>
    %238 = arith.mulf %237, %207 : vector<1x128xf32>
    %239 = arith.addf %205, %238 : vector<1x128xf32>
    %240 = vector.broadcast %239 : vector<1x128xf32> to vector<16x128xf32>
    %241 = arith.subf %4, %240 : vector<16x128xf32>
    %cst_49 = arith.constant 0.000000e+00 : f32
    %242 = vector.broadcast %cst_49 : f32 to vector<16x128xf32>
    %243 = arith.maximumf %242, %241 : vector<16x128xf32>
    %244 = vector.broadcast %cst_4 : f32 to vector<16x128xf32>
    %245 = arith.minimumf %244, %243 : vector<16x128xf32>
    %cst_50 = arith.constant dense<0.000000e+00> : vector<128xf32>
    %246 = vector.multi_reduction <add>, %245, %cst_50 [0] : vector<16x128xf32> to vector<128xf32>
    %247 = vector.shape_cast %246 : vector<128xf32> to vector<1x128xf32>
    %248 = vector.broadcast %cst_5 : f32 to vector<1x128xf32>
    %249 = arith.cmpf ogt, %247, %248 : vector<1x128xf32>
    %250 = arith.extui %249 : vector<1x128xi1> to vector<1x128xi32>
    %251 = arith.sitofp %250 : vector<1x128xi32> to vector<1x128xf32>
    %252 = arith.addf %236, %251 : vector<1x128xf32>
    %253 = arith.mulf %207, %252 : vector<1x128xf32>
    %254 = arith.addf %205, %253 : vector<1x128xf32>
    %c5_i32 = arith.constant 5 : i32
    %cst_51 = arith.constant 2.500000e-01 : f32
    %255 = vector.broadcast %cst_51 : f32 to vector<1x128xf32>
    %256 = arith.mulf %255, %207 : vector<1x128xf32>
    %257 = arith.addf %254, %256 : vector<1x128xf32>
    %258 = vector.broadcast %257 : vector<1x128xf32> to vector<16x128xf32>
    %259 = arith.subf %4, %258 : vector<16x128xf32>
    %cst_52 = arith.constant 0.000000e+00 : f32
    %260 = vector.broadcast %cst_52 : f32 to vector<16x128xf32>
    %261 = arith.maximumf %260, %259 : vector<16x128xf32>
    %262 = vector.broadcast %cst_4 : f32 to vector<16x128xf32>
    %263 = arith.minimumf %262, %261 : vector<16x128xf32>
    %cst_53 = arith.constant dense<0.000000e+00> : vector<128xf32>
    %264 = vector.multi_reduction <add>, %263, %cst_53 [0] : vector<16x128xf32> to vector<128xf32>
    %265 = vector.shape_cast %264 : vector<128xf32> to vector<1x128xf32>
    %266 = vector.broadcast %cst_5 : f32 to vector<1x128xf32>
    %267 = arith.cmpf ogt, %265, %266 : vector<1x128xf32>
    %268 = arith.extui %267 : vector<1x128xi1> to vector<1x128xi32>
    %269 = arith.sitofp %268 : vector<1x128xi32> to vector<1x128xf32>
    %cst_54 = arith.constant 2.000000e+00 : f32
    %270 = vector.broadcast %cst_54 : f32 to vector<1x128xf32>
    %271 = arith.mulf %270, %256 : vector<1x128xf32>
    %272 = arith.addf %254, %271 : vector<1x128xf32>
    %273 = vector.broadcast %272 : vector<1x128xf32> to vector<16x128xf32>
    %274 = arith.subf %4, %273 : vector<16x128xf32>
    %cst_55 = arith.constant 0.000000e+00 : f32
    %275 = vector.broadcast %cst_55 : f32 to vector<16x128xf32>
    %276 = arith.maximumf %275, %274 : vector<16x128xf32>
    %277 = vector.broadcast %cst_4 : f32 to vector<16x128xf32>
    %278 = arith.minimumf %277, %276 : vector<16x128xf32>
    %cst_56 = arith.constant dense<0.000000e+00> : vector<128xf32>
    %279 = vector.multi_reduction <add>, %278, %cst_56 [0] : vector<16x128xf32> to vector<128xf32>
    %280 = vector.shape_cast %279 : vector<128xf32> to vector<1x128xf32>
    %281 = vector.broadcast %cst_5 : f32 to vector<1x128xf32>
    %282 = arith.cmpf ogt, %280, %281 : vector<1x128xf32>
    %283 = arith.extui %282 : vector<1x128xi1> to vector<1x128xi32>
    %284 = arith.sitofp %283 : vector<1x128xi32> to vector<1x128xf32>
    %285 = arith.addf %269, %284 : vector<1x128xf32>
    %cst_57 = arith.constant 3.000000e+00 : f32
    %286 = vector.broadcast %cst_57 : f32 to vector<1x128xf32>
    %287 = arith.mulf %286, %256 : vector<1x128xf32>
    %288 = arith.addf %254, %287 : vector<1x128xf32>
    %289 = vector.broadcast %288 : vector<1x128xf32> to vector<16x128xf32>
    %290 = arith.subf %4, %289 : vector<16x128xf32>
    %cst_58 = arith.constant 0.000000e+00 : f32
    %291 = vector.broadcast %cst_58 : f32 to vector<16x128xf32>
    %292 = arith.maximumf %291, %290 : vector<16x128xf32>
    %293 = vector.broadcast %cst_4 : f32 to vector<16x128xf32>
    %294 = arith.minimumf %293, %292 : vector<16x128xf32>
    %cst_59 = arith.constant dense<0.000000e+00> : vector<128xf32>
    %295 = vector.multi_reduction <add>, %294, %cst_59 [0] : vector<16x128xf32> to vector<128xf32>
    %296 = vector.shape_cast %295 : vector<128xf32> to vector<1x128xf32>
    %297 = vector.broadcast %cst_5 : f32 to vector<1x128xf32>
    %298 = arith.cmpf ogt, %296, %297 : vector<1x128xf32>
    %299 = arith.extui %298 : vector<1x128xi1> to vector<1x128xi32>
    %300 = arith.sitofp %299 : vector<1x128xi32> to vector<1x128xf32>
    %301 = arith.addf %285, %300 : vector<1x128xf32>
    %302 = arith.mulf %256, %301 : vector<1x128xf32>
    %303 = arith.addf %254, %302 : vector<1x128xf32>
    %c6_i32 = arith.constant 6 : i32
    %cst_60 = arith.constant 2.500000e-01 : f32
    %304 = vector.broadcast %cst_60 : f32 to vector<1x128xf32>
    %305 = arith.mulf %304, %256 : vector<1x128xf32>
    %306 = arith.addf %303, %305 : vector<1x128xf32>
    %307 = vector.broadcast %306 : vector<1x128xf32> to vector<16x128xf32>
    %308 = arith.subf %4, %307 : vector<16x128xf32>
    %cst_61 = arith.constant 0.000000e+00 : f32
    %309 = vector.broadcast %cst_61 : f32 to vector<16x128xf32>
    %310 = arith.maximumf %309, %308 : vector<16x128xf32>
    %311 = vector.broadcast %cst_4 : f32 to vector<16x128xf32>
    %312 = arith.minimumf %311, %310 : vector<16x128xf32>
    %cst_62 = arith.constant dense<0.000000e+00> : vector<128xf32>
    %313 = vector.multi_reduction <add>, %312, %cst_62 [0] : vector<16x128xf32> to vector<128xf32>
    %314 = vector.shape_cast %313 : vector<128xf32> to vector<1x128xf32>
    %315 = vector.broadcast %cst_5 : f32 to vector<1x128xf32>
    %316 = arith.cmpf ogt, %314, %315 : vector<1x128xf32>
    %317 = arith.extui %316 : vector<1x128xi1> to vector<1x128xi32>
    %318 = arith.sitofp %317 : vector<1x128xi32> to vector<1x128xf32>
    %cst_63 = arith.constant 2.000000e+00 : f32
    %319 = vector.broadcast %cst_63 : f32 to vector<1x128xf32>
    %320 = arith.mulf %319, %305 : vector<1x128xf32>
    %321 = arith.addf %303, %320 : vector<1x128xf32>
    %322 = vector.broadcast %321 : vector<1x128xf32> to vector<16x128xf32>
    %323 = arith.subf %4, %322 : vector<16x128xf32>
    %cst_64 = arith.constant 0.000000e+00 : f32
    %324 = vector.broadcast %cst_64 : f32 to vector<16x128xf32>
    %325 = arith.maximumf %324, %323 : vector<16x128xf32>
    %326 = vector.broadcast %cst_4 : f32 to vector<16x128xf32>
    %327 = arith.minimumf %326, %325 : vector<16x128xf32>
    %cst_65 = arith.constant dense<0.000000e+00> : vector<128xf32>
    %328 = vector.multi_reduction <add>, %327, %cst_65 [0] : vector<16x128xf32> to vector<128xf32>
    %329 = vector.shape_cast %328 : vector<128xf32> to vector<1x128xf32>
    %330 = vector.broadcast %cst_5 : f32 to vector<1x128xf32>
    %331 = arith.cmpf ogt, %329, %330 : vector<1x128xf32>
    %332 = arith.extui %331 : vector<1x128xi1> to vector<1x128xi32>
    %333 = arith.sitofp %332 : vector<1x128xi32> to vector<1x128xf32>
    %334 = arith.addf %318, %333 : vector<1x128xf32>
    %cst_66 = arith.constant 3.000000e+00 : f32
    %335 = vector.broadcast %cst_66 : f32 to vector<1x128xf32>
    %336 = arith.mulf %335, %305 : vector<1x128xf32>
    %337 = arith.addf %303, %336 : vector<1x128xf32>
    %338 = vector.broadcast %337 : vector<1x128xf32> to vector<16x128xf32>
    %339 = arith.subf %4, %338 : vector<16x128xf32>
    %cst_67 = arith.constant 0.000000e+00 : f32
    %340 = vector.broadcast %cst_67 : f32 to vector<16x128xf32>
    %341 = arith.maximumf %340, %339 : vector<16x128xf32>
    %342 = vector.broadcast %cst_4 : f32 to vector<16x128xf32>
    %343 = arith.minimumf %342, %341 : vector<16x128xf32>
    %cst_68 = arith.constant dense<0.000000e+00> : vector<128xf32>
    %344 = vector.multi_reduction <add>, %343, %cst_68 [0] : vector<16x128xf32> to vector<128xf32>
    %345 = vector.shape_cast %344 : vector<128xf32> to vector<1x128xf32>
    %346 = vector.broadcast %cst_5 : f32 to vector<1x128xf32>
    %347 = arith.cmpf ogt, %345, %346 : vector<1x128xf32>
    %348 = arith.extui %347 : vector<1x128xi1> to vector<1x128xi32>
    %349 = arith.sitofp %348 : vector<1x128xi32> to vector<1x128xf32>
    %350 = arith.addf %334, %349 : vector<1x128xf32>
    %351 = arith.mulf %305, %350 : vector<1x128xf32>
    %352 = arith.addf %303, %351 : vector<1x128xf32>
    %c7_i32 = arith.constant 7 : i32
    %cst_69 = arith.constant 2.500000e-01 : f32
    %353 = vector.broadcast %cst_69 : f32 to vector<1x128xf32>
    %354 = arith.mulf %353, %305 : vector<1x128xf32>
    %355 = arith.addf %352, %354 : vector<1x128xf32>
    %356 = vector.broadcast %355 : vector<1x128xf32> to vector<16x128xf32>
    %357 = arith.subf %4, %356 : vector<16x128xf32>
    %cst_70 = arith.constant 0.000000e+00 : f32
    %358 = vector.broadcast %cst_70 : f32 to vector<16x128xf32>
    %359 = arith.maximumf %358, %357 : vector<16x128xf32>
    %360 = vector.broadcast %cst_4 : f32 to vector<16x128xf32>
    %361 = arith.minimumf %360, %359 : vector<16x128xf32>
    %cst_71 = arith.constant dense<0.000000e+00> : vector<128xf32>
    %362 = vector.multi_reduction <add>, %361, %cst_71 [0] : vector<16x128xf32> to vector<128xf32>
    %363 = vector.shape_cast %362 : vector<128xf32> to vector<1x128xf32>
    %364 = vector.broadcast %cst_5 : f32 to vector<1x128xf32>
    %365 = arith.cmpf ogt, %363, %364 : vector<1x128xf32>
    %366 = arith.extui %365 : vector<1x128xi1> to vector<1x128xi32>
    %367 = arith.sitofp %366 : vector<1x128xi32> to vector<1x128xf32>
    %cst_72 = arith.constant 2.000000e+00 : f32
    %368 = vector.broadcast %cst_72 : f32 to vector<1x128xf32>
    %369 = arith.mulf %368, %354 : vector<1x128xf32>
    %370 = arith.addf %352, %369 : vector<1x128xf32>
    %371 = vector.broadcast %370 : vector<1x128xf32> to vector<16x128xf32>
    %372 = arith.subf %4, %371 : vector<16x128xf32>
    %cst_73 = arith.constant 0.000000e+00 : f32
    %373 = vector.broadcast %cst_73 : f32 to vector<16x128xf32>
    %374 = arith.maximumf %373, %372 : vector<16x128xf32>
    %375 = vector.broadcast %cst_4 : f32 to vector<16x128xf32>
    %376 = arith.minimumf %375, %374 : vector<16x128xf32>
    %cst_74 = arith.constant dense<0.000000e+00> : vector<128xf32>
    %377 = vector.multi_reduction <add>, %376, %cst_74 [0] : vector<16x128xf32> to vector<128xf32>
    %378 = vector.shape_cast %377 : vector<128xf32> to vector<1x128xf32>
    %379 = vector.broadcast %cst_5 : f32 to vector<1x128xf32>
    %380 = arith.cmpf ogt, %378, %379 : vector<1x128xf32>
    %381 = arith.extui %380 : vector<1x128xi1> to vector<1x128xi32>
    %382 = arith.sitofp %381 : vector<1x128xi32> to vector<1x128xf32>
    %383 = arith.addf %367, %382 : vector<1x128xf32>
    %cst_75 = arith.constant 3.000000e+00 : f32
    %384 = vector.broadcast %cst_75 : f32 to vector<1x128xf32>
    %385 = arith.mulf %384, %354 : vector<1x128xf32>
    %386 = arith.addf %352, %385 : vector<1x128xf32>
    %387 = vector.broadcast %386 : vector<1x128xf32> to vector<16x128xf32>
    %388 = arith.subf %4, %387 : vector<16x128xf32>
    %cst_76 = arith.constant 0.000000e+00 : f32
    %389 = vector.broadcast %cst_76 : f32 to vector<16x128xf32>
    %390 = arith.maximumf %389, %388 : vector<16x128xf32>
    %391 = vector.broadcast %cst_4 : f32 to vector<16x128xf32>
    %392 = arith.minimumf %391, %390 : vector<16x128xf32>
    %cst_77 = arith.constant dense<0.000000e+00> : vector<128xf32>
    %393 = vector.multi_reduction <add>, %392, %cst_77 [0] : vector<16x128xf32> to vector<128xf32>
    %394 = vector.shape_cast %393 : vector<128xf32> to vector<1x128xf32>
    %395 = vector.broadcast %cst_5 : f32 to vector<1x128xf32>
    %396 = arith.cmpf ogt, %394, %395 : vector<1x128xf32>
    %397 = arith.extui %396 : vector<1x128xi1> to vector<1x128xi32>
    %398 = arith.sitofp %397 : vector<1x128xi32> to vector<1x128xf32>
    %399 = arith.addf %383, %398 : vector<1x128xf32>
    %400 = arith.mulf %354, %399 : vector<1x128xf32>
    %401 = arith.addf %352, %400 : vector<1x128xf32>
    %402 = arith.addf %401, %354 : vector<1x128xf32>
    %cst_78 = arith.constant 5.000000e-01 : f32
    %403 = vector.broadcast %cst_78 : f32 to vector<1x128xf32>
    %404 = arith.mulf %403, %354 : vector<1x128xf32>
    %405 = arith.addf %401, %404 : vector<1x128xf32>
    %cst_79 = arith.constant 1.000000e+00 : f32
    %cst_80 = arith.constant 1.000000e+00 : f32
    %c0_i32_81 = arith.constant 0 : i32
    %406 = vector.broadcast %405 : vector<1x128xf32> to vector<16x128xf32>
    %407 = arith.subf %4, %406 : vector<16x128xf32>
    %cst_82 = arith.constant 0.000000e+00 : f32
    %408 = vector.broadcast %cst_82 : f32 to vector<16x128xf32>
    %409 = arith.maximumf %408, %407 : vector<16x128xf32>
    %410 = vector.broadcast %cst_79 : f32 to vector<16x128xf32>
    %411 = arith.minimumf %410, %409 : vector<16x128xf32>
    %cst_83 = arith.constant dense<0.000000e+00> : vector<128xf32>
    %412 = vector.multi_reduction <add>, %411, %cst_83 [0] : vector<16x128xf32> to vector<128xf32>
    %413 = vector.shape_cast %412 : vector<128xf32> to vector<1x128xf32>
    %cst_84 = arith.constant 0.000000e+00 : f32
    %414 = vector.broadcast %cst_84 : f32 to vector<16x128xf32>
    %415 = arith.cmpf ogt, %407, %414 : vector<16x128xf32>
    %416 = vector.broadcast %cst_79 : f32 to vector<16x128xf32>
    %417 = arith.cmpf olt, %407, %416 : vector<16x128xf32>
    %418 = arith.andi %415, %417 : vector<16x128xi1>
    %419 = arith.extui %418 : vector<16x128xi1> to vector<16x128xi32>
    %420 = arith.sitofp %419 : vector<16x128xi32> to vector<16x128xf32>
    %cst_85 = arith.constant dense<0.000000e+00> : vector<128xf32>
    %421 = vector.multi_reduction <add>, %420, %cst_85 [0] : vector<16x128xf32> to vector<128xf32>
    %422 = vector.shape_cast %421 : vector<128xf32> to vector<1x128xf32>
    %423 = vector.broadcast %cst_80 : f32 to vector<1x128xf32>
    %424 = arith.cmpf ogt, %413, %423 : vector<1x128xf32>
    %425 = arith.select %424, %405, %401 : vector<1x128xi1>, vector<1x128xf32>
    %426 = arith.select %424, %402, %405 : vector<1x128xi1>, vector<1x128xf32>
    %427 = vector.broadcast %cst_80 : f32 to vector<1x128xf32>
    %428 = arith.subf %413, %427 : vector<1x128xf32>
    %429 = vector.broadcast %cst_80 : f32 to vector<1x128xf32>
    %430 = arith.maximumf %422, %429 : vector<1x128xf32>
    %431 = arith.divf %428, %430 : vector<1x128xf32>
    %432 = arith.addf %405, %431 : vector<1x128xf32>
    %433 = arith.maximumf %425, %432 : vector<1x128xf32>
    %434 = arith.minimumf %426, %433 : vector<1x128xf32>
    %c1_i32_86 = arith.constant 1 : i32
    %435 = vector.broadcast %434 : vector<1x128xf32> to vector<16x128xf32>
    %436 = arith.subf %4, %435 : vector<16x128xf32>
    %cst_87 = arith.constant 0.000000e+00 : f32
    %437 = vector.broadcast %cst_87 : f32 to vector<16x128xf32>
    %438 = arith.maximumf %437, %436 : vector<16x128xf32>
    %439 = vector.broadcast %cst_79 : f32 to vector<16x128xf32>
    %440 = arith.minimumf %439, %438 : vector<16x128xf32>
    %cst_88 = arith.constant dense<0.000000e+00> : vector<128xf32>
    %441 = vector.multi_reduction <add>, %440, %cst_88 [0] : vector<16x128xf32> to vector<128xf32>
    %442 = vector.shape_cast %441 : vector<128xf32> to vector<1x128xf32>
    %cst_89 = arith.constant 0.000000e+00 : f32
    %443 = vector.broadcast %cst_89 : f32 to vector<16x128xf32>
    %444 = arith.cmpf ogt, %436, %443 : vector<16x128xf32>
    %445 = vector.broadcast %cst_79 : f32 to vector<16x128xf32>
    %446 = arith.cmpf olt, %436, %445 : vector<16x128xf32>
    %447 = arith.andi %444, %446 : vector<16x128xi1>
    %448 = arith.extui %447 : vector<16x128xi1> to vector<16x128xi32>
    %449 = arith.sitofp %448 : vector<16x128xi32> to vector<16x128xf32>
    %cst_90 = arith.constant dense<0.000000e+00> : vector<128xf32>
    %450 = vector.multi_reduction <add>, %449, %cst_90 [0] : vector<16x128xf32> to vector<128xf32>
    %451 = vector.shape_cast %450 : vector<128xf32> to vector<1x128xf32>
    %452 = vector.broadcast %cst_80 : f32 to vector<1x128xf32>
    %453 = arith.cmpf ogt, %442, %452 : vector<1x128xf32>
    %454 = arith.select %453, %434, %425 : vector<1x128xi1>, vector<1x128xf32>
    %455 = arith.select %453, %426, %434 : vector<1x128xi1>, vector<1x128xf32>
    %456 = vector.broadcast %cst_80 : f32 to vector<1x128xf32>
    %457 = arith.subf %442, %456 : vector<1x128xf32>
    %458 = vector.broadcast %cst_80 : f32 to vector<1x128xf32>
    %459 = arith.maximumf %451, %458 : vector<1x128xf32>
    %460 = arith.divf %457, %459 : vector<1x128xf32>
    %461 = arith.addf %434, %460 : vector<1x128xf32>
    %462 = arith.maximumf %454, %461 : vector<1x128xf32>
    %463 = arith.minimumf %455, %462 : vector<1x128xf32>
    %c2_i32_91 = arith.constant 2 : i32
    %464 = vector.broadcast %463 : vector<1x128xf32> to vector<16x128xf32>
    %465 = arith.subf %4, %464 : vector<16x128xf32>
    %cst_92 = arith.constant 0.000000e+00 : f32
    %466 = vector.broadcast %cst_92 : f32 to vector<16x128xf32>
    %467 = arith.maximumf %466, %465 : vector<16x128xf32>
    %468 = vector.broadcast %cst_79 : f32 to vector<16x128xf32>
    %469 = arith.minimumf %468, %467 : vector<16x128xf32>
    %cst_93 = arith.constant dense<0.000000e+00> : vector<128xf32>
    %470 = vector.multi_reduction <add>, %469, %cst_93 [0] : vector<16x128xf32> to vector<128xf32>
    %471 = vector.shape_cast %470 : vector<128xf32> to vector<1x128xf32>
    %cst_94 = arith.constant 0.000000e+00 : f32
    %472 = vector.broadcast %cst_94 : f32 to vector<16x128xf32>
    %473 = arith.cmpf ogt, %465, %472 : vector<16x128xf32>
    %474 = vector.broadcast %cst_79 : f32 to vector<16x128xf32>
    %475 = arith.cmpf olt, %465, %474 : vector<16x128xf32>
    %476 = arith.andi %473, %475 : vector<16x128xi1>
    %477 = arith.extui %476 : vector<16x128xi1> to vector<16x128xi32>
    %478 = arith.sitofp %477 : vector<16x128xi32> to vector<16x128xf32>
    %cst_95 = arith.constant dense<0.000000e+00> : vector<128xf32>
    %479 = vector.multi_reduction <add>, %478, %cst_95 [0] : vector<16x128xf32> to vector<128xf32>
    %480 = vector.shape_cast %479 : vector<128xf32> to vector<1x128xf32>
    %481 = vector.broadcast %cst_80 : f32 to vector<1x128xf32>
    %482 = arith.cmpf ogt, %471, %481 : vector<1x128xf32>
    %483 = arith.select %482, %463, %454 : vector<1x128xi1>, vector<1x128xf32>
    %484 = arith.select %482, %455, %463 : vector<1x128xi1>, vector<1x128xf32>
    %485 = vector.broadcast %cst_80 : f32 to vector<1x128xf32>
    %486 = arith.subf %471, %485 : vector<1x128xf32>
    %487 = vector.broadcast %cst_80 : f32 to vector<1x128xf32>
    %488 = arith.maximumf %480, %487 : vector<1x128xf32>
    %489 = arith.divf %486, %488 : vector<1x128xf32>
    %490 = arith.addf %463, %489 : vector<1x128xf32>
    %491 = arith.maximumf %483, %490 : vector<1x128xf32>
    %492 = arith.minimumf %484, %491 : vector<1x128xf32>
    %493 = vector.broadcast %492 : vector<1x128xf32> to vector<16x128xf32>
    %494 = arith.subf %4, %493 : vector<16x128xf32>
    %cst_96 = arith.constant 0.000000e+00 : f32
    %cst_97 = arith.constant 1.000000e+00 : f32
    %495 = vector.broadcast %cst_96 : f32 to vector<16x128xf32>
    %496 = arith.maximumf %495, %494 : vector<16x128xf32>
    %497 = vector.broadcast %cst_97 : f32 to vector<16x128xf32>
    %498 = arith.minimumf %497, %496 : vector<16x128xf32>
    %499 = tpu.transpose %498, [1, 0] : vector<16x128xf32> -> vector<128x16xf32>
    %c0_98 = arith.constant 0 : index
    %c0_99 = arith.constant 0 : index
    %500 = vector.load %arg3[%c0_98, %c0_99] : memref<128x16xf32, #tpu.memory_space<vmem>>, vector<128x16xf32>
    tpu.vector_store %arg3[%c0_98, %c0_99], %499 {strides = array<i32>} : memref<128x16xf32, #tpu.memory_space<vmem>>, vector<128x16xf32>,
    return
  }
  func.func @transform_0(%arg0: i32) -> (i32, i32) {
    %c0_i32 = arith.constant 0 : i32
    %c0_i32_0 = arith.constant 0 : i32
    return %arg0, %c0_i32 : i32, i32
  }
  func.func @transform_1(%arg0: i32) -> (i32, i32) {
    %c0_i32 = arith.constant 0 : i32
    %c0_i32_0 = arith.constant 0 : i32
    return %arg0, %c0_i32 : i32, i32
  }
  func.func @transform_2(%arg0: i32) -> (i32, i32) {
    %c0_i32 = arith.constant 0 : i32
    %c0_i32_0 = arith.constant 0 : i32
    return %arg0, %c0_i32 : i32, i32
  }
}

</mosaic_0001>

<bundles_post_ra>
// kernel: tpu_custom_call.1
= control target key start
LH: loop header
LB: loop body
LE: loop exit
PB: predicated region body
PF: predicated region fallthrough
CT: control target
= control target key end

     0   :  { %v1210_v2 = vmov 0   ;;  %s1501_s0 = inlined_call_operand.vmem [shape: f32[8,16], index: 0, kind: input, shape index: {}]   ;;  %s1502_s1 = inlined_call_operand.vmem [shape: f32[8,1], index: 1, kind: input, shape index: {}]   ;;  %s1503_s2 = inlined_call_operand.hbm [shape: f32[8,16], index: 2, kind: output, shape index: {}]  }
   0x1   :  { %v30_v0 = vld [vmem:[%s1502_s1 + $0x10] sm:$0xff]  ;;  %v28_v1 = vld [vmem:[%s1502_s1] sm:$0xff]  ;;  %1144 = vset.pattern.permute.xlu1 %v1210_v2  ;;  %1143 = vset.pattern.permute.xlu0 %v1210_v2 }
   0x2   :  { %v32_v3 = vld [vmem:[%s1502_s1 + $0x20] sm:$0xff]  ;;  %56 = vperm.xlu1 %1144, %v30_v0   ;;  %46 = vperm.xlu0 %1143, %v28_v1  }
   0x3   :  { %1145 = vset.pattern.permute.xlu2 %v1210_v2 }
   0x4   :  { %66 = vperm.xlu2 %1145, %v32_v3  }
   0x5   :  { %7 = vsyncpa [#allocation3], 0  ;;  %v31_v4 = vld [vmem:[%s1502_s1 + $0x18] sm:$0xff]  ;;  %v29_v5 = vld [vmem:[%s1502_s1 + $0x8] sm:$0xff] }
   0x6   :  { %v33_v6 = vld [vmem:[%s1502_s1 + $0x28] sm:$0xff]  ;;  %v35_v7 = vld [vmem:[%s1502_s1 + $0x38] sm:$0xff]  ;;  %v34_v8 = vld [vmem:[%s1502_s1 + $0x30] sm:$0xff] }
   0x7   :  { %v36_v9 = vld [vmem:[%s1502_s1 + $0x40] sm:$0xff]  ;;  %v38_v10 = vld [vmem:[%s1502_s1 + $0x50] sm:$0xff]  ;;  %v37_v11 = vld [vmem:[%s1502_s1 + $0x48] sm:$0xff] }
   0x8   :  { %v39_v12 = vld [vmem:[%s1502_s1 + $0x58] sm:$0xff]  ;;  %v41_v13 = vld [vmem:[%s1502_s1 + $0x68] sm:$0xff]  ;;  %v40_v14 = vld [vmem:[%s1502_s1 + $0x60] sm:$0xff] }
   0x9   :  { %v42_v15 = vld [vmem:[%s1502_s1 + $0x70] sm:$0xff]  ;;  %v43_v16 = vld [vmem:[%s1502_s1 + $0x78] sm:$0xff]  ;;  %v12_v35 = vld [vmem:[%s1501_s0] sm:$0xff] }
   0xa   :  { %61 = vperm.xlu1 %1144, %v31_v4   ;;  %51 = vperm.xlu0 %1143, %v29_v5   ;;  %v13_v48 = vld [vmem:[%s1501_s0 + $0x8] sm:$0xff]  ;;  %v14_v62 = vld [vmem:[%s1501_s0 + $0x10] sm:$0xff] }
   0xc   :  { %71 = vperm.xlu2 %1145, %v33_v6  }
  0x12   :  { %81 = vperm.xlu1 %1144, %v35_v7   ;;  %76 = vperm.xlu0 %1143, %v34_v8  }
  0x14   :  { %86 = vperm.xlu2 %1145, %v36_v9  }
  0x1a   :  { %96 = vperm.xlu1 %1144, %v38_v10   ;;  %91 = vperm.xlu0 %1143, %v37_v11  }
  0x1c   :  { %101 = vperm.xlu2 %1145, %v39_v12   ;;  %v15_v12 = vld [vmem:[%s1501_s0 + $0x18] sm:$0xff] }
  0x22   :  { %111 = vperm.xlu1 %1144, %v41_v13   ;;  %106 = vperm.xlu0 %1143, %v40_v14  }
  0x24   :  { %116 = vperm.xlu2 %1145, %v42_v15  }
  0x2a   :  { %121 = vperm.xlu0 %1143, %v43_v16  }
  0x5e   :  { %v1284_v36 = vpop.permute.xlu2 %66 }
  0x5f   :  { %vm189_vm15 = vweird.f32 %v1284_v36  ;;  %v195_v11 = vand.u32 2147483648, %v1284_v36  ;;  %v193_v15 = vand.u32 2147483647, %v1284_v36 }
  0x66   :  { %v72_v57 = vpop.permute.xlu2 %71 }
  0x74   :  { %v47_v17 = vpop.permute.xlu0 %46  ;;  %v57_v18 = vpop.permute.xlu1 %56 }
  0x75   :  { %1146 = vrcp.f32 %v47_v17  ;;  %v135_v27 = vand.u32 2147483648, %v47_v17  ;;  %v133_v31 = vand.u32 2147483647, %v47_v17  ;;  %vm129_vm1 = vweird.f32 %v47_v17 }
  0x76   :  { %1148 = vrcp.f32 %v57_v18  ;;  %vm159_vm6 = vweird.f32 %v57_v18  ;;  %v165_v49 = vand.u32 2147483648, %v57_v18  ;;  %v163_v52 = vand.u32 2147483647, %v57_v18 }
  0x77   :  { %v136_v33 = vor.u32 1.1754944e-38, %v135_v27  ;;  %vm134_vm3 = vcmp.eq.f32.partialorder %v133_v31, 8.507059e+37  ;;  %v87_v31 = vpop.permute.xlu2 %86 }
  0x78   :  { %v166_v58 = vor.u32 1.1754944e-38, %v165_v49  ;;  %vm164_vm11 = vcmp.eq.f32.partialorder %v163_v52, 8.507059e+37 }
  0x7b   :  { %v1147_v19 = vpop.eup %1146 }
  0x7c   :  { %v52_v20 = vpop.permute.xlu0 %51  ;;  %v125_v21 = vmul.f32 %v1147_v19, %v47_v17  ;;  %v1278_v24 = vpop.permute.xlu1 %61  ;;  %vm130_vm0 = vweird.f32 %v1147_v19 }
  0x7d   :  { %1150 = vrcp.f32 %v52_v20  ;;  %v1149_v25 = vpop.eup %1148  ;;  %vm131_vm2 = vmor %vm129_vm1, %vm130_vm0  ;;  %v150_v41 = vand.u32 2147483648, %v52_v20  ;;  %v148_v44 = vand.u32 2147483647, %v52_v20  ;;  %vm144_vm5 = vweird.f32 %v52_v20 }
  0x7e   :  { %v126_v22 = vsub.f32 1.0, %v125_v21  ;;  %1152 = vrcp.f32 %v1278_v24  ;;  %v155_v29 = vmul.f32 %v1149_v25, %v57_v18  ;;  %vm160_vm7 = vweird.f32 %v1149_v25 }
  0x7f   :  { %1154 = vrcp.f32 %v1284_v36  ;;  %v151_v47 = vor.u32 1.1754944e-38, %v150_v41  ;;  %vm149_vm9 = vcmp.eq.f32.partialorder %v148_v44, 8.507059e+37  ;;  %vm161_vm10 = vmor %vm159_vm6, %vm160_vm7  ;;  %vm174_vm12 = vweird.f32 %v1278_v24 }
  0x80   :  { %v127_v23 = vmul.f32 %v1147_v19, %v126_v22  ;;  %v156_v37 = vsub.f32 1.0, %v155_v29  ;;  %1156 = vrcp.f32 %v72_v57  ;;  %v180_v4 = vand.u32 2147483648, %v1278_v24 }
  0x81   :  { %v178_v5 = vand.u32 2147483647, %v1278_v24 }
  0x82   :  { %v128_v30 = vadd.f32 %v1147_v19, %v127_v23  ;;  %v157_v45 = vmul.f32 %v1149_v25, %v156_v37  ;;  %v181_v10 = vor.u32 1.1754944e-38, %v180_v4  ;;  %v17_v37 = vld [vmem:[%s1501_s0 + $0x28] sm:$0xff] }
  0x83   :  { %v1151_v26 = vpop.eup %1150  ;;  %vm179_vm1 = vcmp.eq.f32.partialorder %v178_v5, 8.507059e+37 }
  0x84   :  { %v140_v28 = vmul.f32 %v1151_v26, %v52_v20  ;;  %v132_v38 = vsel %vm131_vm2, %v1147_v19, %v128_v30  ;;  %v1153_v39 = vpop.eup %1152  ;;  %vm145_vm4 = vweird.f32 %v1151_v26  ;;  %v158_v51 = vadd.f32 %v1149_v25, %v157_v45  ;;  %v1296_v2 = vpop.permute.xlu0 %76 }
  0x85   :  { %v137_v40 = vsel %vm134_vm3, %v136_v33, %v132_v38  ;;  %v170_v46 = vmul.f32 %v1153_v39, %v1278_v24  ;;  %vm146_vm8 = vmor %vm144_vm5, %vm145_vm4  ;;  %v1155_v55 = vpop.eup %1154  ;;  %vm175_vm13 = vweird.f32 %v1153_v39  ;;  %1158 = vrcp.f32 %v1296_v2  ;;  %v1307_v17 = vpop.permute.xlu1 %81 }
  0x86   :  { %v141_v32 = vsub.f32 1.0, %v140_v28  ;;  %v138_v42 = vmul.f32 %v137_v40, %v12_v35  ;;  %v185_v59 = vmul.f32 %v1155_v55, %v1284_v36  ;;  %v162_v61 = vsel %vm161_vm10, %v1149_v25, %v158_v51  ;;  %v1157_v3 = vpop.eup %1156  ;;  %vm176_vm14 = vmor %vm174_vm12, %vm175_vm13  ;;  %v16_v25 = vld [vmem:[%s1501_s0 + $0x20] sm:$0xff] }
  0x87   :  { %v171_v53 = vsub.f32 1.0, %v170_v46  ;;  %v167_v63 = vsel %vm164_vm11, %v166_v58, %v162_v61  ;;  %v200_v8 = vmul.f32 %v1157_v3, %v72_v57  ;;  %vm190_vm0 = vweird.f32 %v1155_v55 }
  0x88   :  { %v142_v34 = vmul.f32 %v1151_v26, %v141_v32  ;;  %364 = vxpose.xlu1.b32.start [1/16] (narrow) %v138_v42, 16  ;;  %v186_v0 = vsub.f32 1.0, %v185_v59  ;;  %v168_v6 = vmul.f32 %v167_v63, %v14_v62  ;;  %vm191_vm2 = vmor %vm189_vm15, %vm190_vm0  ;;  %v196_v20 = vor.u32 1.1754944e-38, %v195_v11 }
  0x89   :  { %v172_v60 = vmul.f32 %v1153_v39, %v171_v53  ;;  %v201_v16 = vsub.f32 1.0, %v200_v8  ;;  %1160 = vrcp.f32 %v1307_v17  ;;  %vm194_vm3 = vcmp.eq.f32.partialorder %v193_v15, 8.507059e+37 }
  0x8a   :  { %v143_v43 = vadd.f32 %v1151_v26, %v142_v34  ;;  %v187_v7 = vmul.f32 %v1155_v55, %v186_v0  ;;  %vm204_vm4 = vweird.f32 %v72_v57  ;;  %vm205_vm5 = vweird.f32 %v1157_v3  ;;  %v19_v0 = vld [vmem:[%s1501_s0 + $0x38] sm:$0xff] }
  0x8b   :  { %v173_v1 = vadd.f32 %v1153_v39, %v172_v60  ;;  %v1159_v18 = vpop.eup %1158  ;;  %v202_v21 = vmul.f32 %v1157_v3, %v201_v16  ;;  %v210_v24 = vand.u32 2147483648, %v72_v57  ;;  %v208_v28 = vand.u32 2147483647, %v72_v57  ;;  %vm206_vm6 = vmor %vm204_vm4, %vm205_vm5 }
  0x8c   :  { %v147_v50 = vsel %vm146_vm8, %v1151_v26, %v143_v43  ;;  %v188_v14 = vadd.f32 %v1155_v55, %v187_v7  ;;  %v215_v22 = vmul.f32 %v1159_v18, %v1296_v2  ;;  %1162 = vrcp.f32 %v87_v31  ;;  %v1318_v41 = vpop.permute.xlu0 %91 }
  0x8d   :  { %v152_v54 = vsel %vm149_vm9, %v151_v47, %v147_v50  ;;  %v177_v9 = vsel %vm176_vm14, %v1153_v39, %v173_v1  ;;  %v203_v27 = vadd.f32 %v1157_v3, %v202_v21  ;;  %v211_v33 = vor.u32 1.1754944e-38, %v210_v24  ;;  %v18_v50 = vld [vmem:[%s1501_s0 + $0x30] sm:$0xff] }
  0x8e   :  { %v153_v56 = vmul.f32 %v152_v54, %v13_v48  ;;  %v182_v13 = vsel %vm179_vm1, %v181_v10, %v177_v9  ;;  %v192_v23 = vsel %vm191_vm2, %v1155_v55, %v188_v14  ;;  %v216_v29 = vsub.f32 1.0, %v215_v22  ;;  %v1327_v54 = vpop.permute.xlu1 %96 }
  0x8f   :  { %v183_v19 = vmul.f32 %v182_v13, %v15_v12  ;;  %v197_v26 = vsel %vm194_vm3, %v196_v20, %v192_v23  ;;  %v1161_v30 = vpop.eup %1160  ;;  %vm209_vm7 = vcmp.eq.f32.partialorder %v208_v28, 8.507059e+37  ;;  %v207_v36 = vsel %vm206_vm6, %v1157_v3, %v203_v27  ;;  %v20_v12 = vld [vmem:[%s1501_s0 + $0x40] sm:$0xff] }
  0x90   :  { %365 = vxpose.xlu1.b32.cont [2/16] (narrow) %v153_v56, 16  ;;  %v198_v32 = vmul.f32 %v197_v26, %v16_v25  ;;  %v230_v34 = vmul.f32 %v1161_v30, %v1307_v17  ;;  %v217_v35 = vmul.f32 %v1159_v18, %v216_v29  ;;  %v212_v38 = vsel %vm209_vm7, %v211_v33, %v207_v36  ;;  %v21_v25 = vld [vmem:[%s1501_s0 + $0x48] sm:$0xff] }
  0x91   :  { %vm220_vm8 = vweird.f32 %v1159_v18  ;;  %v225_v43 = vand.u32 2147483648, %v1296_v2  ;;  %vm219_vm9 = vweird.f32 %v1296_v2  ;;  %v223_v44 = vand.u32 2147483647, %v1296_v2 }
  0x92   :  { %v231_v39 = vsub.f32 1.0, %v230_v34  ;;  %v218_v40 = vadd.f32 %v1159_v18, %v217_v35  ;;  %v1163_v42 = vpop.eup %1162  ;;  %v213_v45 = vmul.f32 %v212_v38, %v17_v37  ;;  %vm221_vm10 = vmor %vm219_vm9, %vm220_vm8  ;;  %1164 = vrcp.f32 %v1318_v41 }
  0x93   :  { %v245_v46 = vmul.f32 %v1163_v42, %v87_v31  ;;  %v226_v49 = vor.u32 1.1754944e-38, %v225_v43  ;;  %vm224_vm11 = vcmp.eq.f32.partialorder %v223_v44, 8.507059e+37  ;;  %vm235_vm12 = vweird.f32 %v1161_v30 }
  0x94   :  { %v232_v47 = vmul.f32 %v1161_v30, %v231_v39  ;;  %v222_v48 = vsel %vm221_vm10, %v1159_v18, %v218_v40  ;;  %v240_v56 = vand.u32 2147483648, %v1307_v17  ;;  %vm234_vm13 = vweird.f32 %v1307_v17  ;;  %v1341_v16 = vpop.permute.xlu0 %106  ;;  %v22_v39 = vld [vmem:[%s1501_s0 + $0x50] sm:$0xff] }
  0x95   :  { %v227_v51 = vsel %vm224_vm11, %v226_v49, %v222_v48  ;;  %v246_v52 = vsub.f32 1.0, %v245_v46  ;;  %v238_v57 = vand.u32 2147483647, %v1307_v17  ;;  %vm236_vm14 = vmor %vm234_vm13, %vm235_vm12  ;;  %1166 = vrcp.f32 %v1327_v54 }
  0x96   :  { %v233_v53 = vadd.f32 %v1161_v30, %v232_v47  ;;  %v228_v58 = vmul.f32 %v227_v51, %v18_v50  ;;  %v241_v62 = vor.u32 1.1754944e-38, %v240_v56  ;;  %vm249_vm15 = vweird.f32 %v87_v31  ;;  %v1350_v29 = vpop.permute.xlu1 %111  ;;  %v23_v51 = vld [vmem:[%s1501_s0 + $0x58] sm:$0xff] }
  0x97   :  { %v247_v59 = vmul.f32 %v1163_v42, %v246_v52  ;;  %vm250_vm0 = vweird.f32 %v1163_v42  ;;  %vm239_vm1 = vcmp.eq.f32.partialorder %v238_v57, 8.507059e+37  ;;  %v255_v63 = vand.u32 2147483648, %v87_v31 }
  0x98   :  { %366 = vxpose.xlu1.b32.cont [3/16] (narrow) %v168_v6, 16  ;;  %v1165_v55 = vpop.eup %1164  ;;  %v237_v61 = vsel %vm236_vm14, %v1161_v30, %v233_v53  ;;  %v253_v3 = vand.u32 2147483647, %v87_v31  ;;  %vm251_vm2 = vmor %vm249_vm15, %vm250_vm0  ;;  %v102_v6 = vpop.permute.xlu2 %101  ;;  %v270_v18 = vand.u32 2147483648, %v1318_v41  ;;  %vm264_vm5 = vweird.f32 %v1318_v41 }
  0x99   :  { %v260_v60 = vmul.f32 %v1165_v55, %v1318_v41  ;;  %v242_v1 = vsel %vm239_vm1, %v241_v62, %v237_v61  ;;  %v248_v2 = vadd.f32 %v1163_v42, %v247_v59  ;;  %v256_v8 = vor.u32 1.1754944e-38, %v255_v63 }
  0x9a   :  { %v243_v7 = vmul.f32 %v242_v1, %v19_v0  ;;  %1168 = vrcp.f32 %v102_v6  ;;  %vm254_vm3 = vcmp.eq.f32.partialorder %v253_v3, 8.507059e+37  ;;  %vm265_vm4 = vweird.f32 %v1165_v55  ;;  %v24_v0 = vld [vmem:[%s1501_s0 + $0x60] sm:$0xff] }
  0x9b   :  { %v261_v4 = vsub.f32 1.0, %v260_v60  ;;  %v1167_v5 = vpop.eup %1166  ;;  %v252_v11 = vsel %vm251_vm2, %v1163_v42, %v248_v2  ;;  %vm266_vm6 = vmor %vm264_vm5, %vm265_vm4  ;;  %1170 = vrcp.f32 %v1341_v16  ;;  %v271_v24 = vor.u32 1.1754944e-38, %v270_v18 }
  0x9c   :  { %v275_v9 = vmul.f32 %v1167_v5, %v1327_v54  ;;  %v257_v13 = vsel %vm254_vm3, %v256_v8, %v252_v11  ;;  %vm280_vm8 = vweird.f32 %v1167_v5  ;;  %v285_v31 = vand.u32 2147483648, %v1327_v54 }
  0x9d   :  { %v262_v10 = vmul.f32 %v1165_v55, %v261_v4  ;;  %v258_v20 = vmul.f32 %v257_v13, %v20_v12  ;;  %vm279_vm9 = vweird.f32 %v1327_v54  ;;  %1172 = vrcp.f32 %v1350_v29  ;;  %v25_v13 = vld [vmem:[%s1501_s0 + $0x68] sm:$0xff] }
  0x9e   :  { %v276_v14 = vsub.f32 1.0, %v275_v9  ;;  %vm281_vm10 = vmor %vm279_vm9, %vm280_vm8  ;;  %v286_v37 = vor.u32 1.1754944e-38, %v285_v31  ;;  %vm294_vm11 = vweird.f32 %v102_v6  ;;  %v300_v38 = vand.u32 2147483648, %v102_v6 }
  0x9f   :  { %v263_v15 = vadd.f32 %v1165_v55, %v262_v10  ;;  %v298_v42 = vand.u32 2147483647, %v102_v6  ;;  %v315_v57 = vand.u32 2147483648, %v1341_v16  ;;  %vm309_vm1 = vweird.f32 %v1341_v16 }
  0xa0   :  { %367 = vxpose.xlu1.b32.cont [4/16] (narrow) %v183_v19, 16  ;;  %v1169_v17 = vpop.eup %1168  ;;  %v268_v19 = vand.u32 2147483647, %v1318_v41  ;;  %v277_v22 = vmul.f32 %v1167_v5, %v276_v14  ;;  %v117_v43 = vpop.permute.xlu2 %116  ;;  %v301_v47 = vor.u32 1.1754944e-38, %v300_v38  ;;  %vm324_vm5 = vweird.f32 %v1350_v29 }
  0xa1   :  { %v290_v21 = vmul.f32 %v1169_v17, %v102_v6  ;;  %v267_v23 = vsel %vm266_vm6, %v1165_v55, %v263_v15  ;;  %v1171_v30 = vpop.eup %1170  ;;  %vm295_vm12 = vweird.f32 %v1169_v17  ;;  %1174 = vrcp.f32 %v117_v43  ;;  %v122_v55 = vpop.permute.xlu0 %121 }
  0xa2   :  { %vm269_vm7 = vcmp.eq.f32.partialorder %v268_v19, 8.507059e+37  ;;  %v278_v28 = vadd.f32 %v1167_v5, %v277_v22  ;;  %v305_v35 = vmul.f32 %v1171_v30, %v1341_v16  ;;  %vm296_vm14 = vmor %vm294_vm11, %vm295_vm12  ;;  %vm299_vm15 = vcmp.eq.f32.partialorder %v298_v42, 8.507059e+37  ;;  %v26_v22 = vld [vmem:[%s1501_s0 + $0x70] sm:$0xff] }
  0xa3   :  { %v272_v26 = vsel %vm269_vm7, %v271_v24, %v267_v23  ;;  %v291_v27 = vsub.f32 1.0, %v290_v21  ;;  %vm310_vm0 = vweird.f32 %v1171_v30  ;;  %1176 = vrcp.f32 %v122_v55 }
  0xa4   :  { %v273_v33 = vmul.f32 %v272_v26, %v21_v25  ;;  %v282_v36 = vsel %vm281_vm10, %v1167_v5, %v278_v28  ;;  %v306_v44 = vsub.f32 1.0, %v305_v35  ;;  %vm311_vm2 = vmor %vm309_vm1, %vm310_vm0  ;;  %v316_v63 = vor.u32 1.1754944e-38, %v315_v57 }
  0xa5   :  { %v292_v34 = vmul.f32 %v1169_v17, %v291_v27  ;;  %v330_v5 = vand.u32 2147483648, %v1350_v29  ;;  %v328_v6 = vand.u32 2147483647, %v1350_v29  ;;  %vm339_vm7 = vweird.f32 %v117_v43 }
  0xa6   :  { %v307_v49 = vmul.f32 %v1171_v30, %v306_v44  ;;  %v345_v12 = vand.u32 2147483648, %v117_v43  ;;  %v360_v25 = vand.u32 2147483648, %v122_v55  ;;  %v358_v26 = vand.u32 2147483647, %v122_v55 }
  0xa7   :  { %v293_v41 = vadd.f32 %v1169_v17, %v292_v34  ;;  %v331_v11 = vor.u32 1.1754944e-38, %v330_v5  ;;  %vm329_vm9 = vcmp.eq.f32.partialorder %v328_v6, 8.507059e+37 }
  0xa8   :  { %368 = vxpose.xlu1.b32.cont [5/16] (narrow) %v198_v32, 16  ;;  %v283_v32 = vand.u32 2147483647, %v1327_v54  ;;  %v308_v54 = vadd.f32 %v1171_v30, %v307_v49  ;;  %v346_v19 = vor.u32 1.1754944e-38, %v345_v12 }
  0xa9   :  { %v297_v50 = vsel %vm296_vm14, %v1169_v17, %v293_v41 }
  0xaa   :  { %vm284_vm13 = vcmp.eq.f32.partialorder %v283_v32, 8.507059e+37  ;;  %v302_v52 = vsel %vm299_vm15, %v301_v47, %v297_v50  ;;  %v312_v62 = vsel %vm311_vm2, %v1171_v30, %v308_v54  ;;  %vm359_vm15 = vcmp.eq.f32.partialorder %v358_v26, 8.507059e+37  ;;  %v27_v30 = vld [vmem:[%s1501_s0 + $0x78] sm:$0xff] }
  0xab   :  { %v287_v40 = vsel %vm284_vm13, %v286_v37, %v282_v36  ;;  %v303_v59 = vmul.f32 %v302_v52, %v23_v51  ;;  %vm354_vm13 = vweird.f32 %v122_v55 }
  0xac   :  { %v288_v46 = vmul.f32 %v287_v40, %v22_v39 }
  0xb0   :  { %369 = vxpose.xlu1.b32.cont [6/16] (narrow) %v213_v45, 16  ;;  %v1173_v45 = vpop.eup %1172 }
  0xb1   :  { %v320_v48 = vmul.f32 %v1173_v45, %v1350_v29  ;;  %v1175_v56 = vpop.eup %1174  ;;  %vm325_vm4 = vweird.f32 %v1173_v45  ;;  %v361_v29 = vor.u32 1.1754944e-38, %v360_v25  ;;  %v1211_v25 = vmov 0.0  }
  0xb2   :  { %v335_v60 = vmul.f32 %v1175_v56, %v117_v43  ;;  %v1177_v4 = vpop.eup %1176  ;;  %vm326_vm6 = vmor %vm324_vm5, %vm325_vm4  ;;  %vm340_vm8 = vweird.f32 %v1175_v56 }
  0xb3   :  { %v321_v53 = vsub.f32 1.0, %v320_v48  ;;  %v350_v9 = vmul.f32 %v1177_v4, %v122_v55  ;;  %vm341_vm10 = vmor %vm339_vm7, %vm340_vm8  ;;  %vm355_vm12 = vweird.f32 %v1177_v4 }
  0xb4   :  { %v336_v2 = vsub.f32 1.0, %v335_v60  ;;  %vm356_vm14 = vmor %vm354_vm13, %vm355_vm12 }
  0xb5   :  { %v322_v61 = vmul.f32 %v1173_v45, %v321_v53  ;;  %v351_v17 = vsub.f32 1.0, %v350_v9 }
  0xb6   :  { %v337_v8 = vmul.f32 %v1175_v56, %v336_v2 }
  0xb7   :  { %v323_v3 = vadd.f32 %v1173_v45, %v322_v61 }
  0xb8   :  { %370 = vxpose.xlu1.b32.cont [7/16] (narrow) %v228_v58, 16  ;;  %v313_v58 = vand.u32 2147483647, %v1341_v16  ;;  %v338_v15 = vadd.f32 %v1175_v56, %v337_v8  ;;  %v343_v16 = vand.u32 2147483647, %v117_v43 }
  0xb9   :  { %v327_v10 = vsel %vm326_vm6, %v1173_v45, %v323_v3 }
  0xba   :  { %vm314_vm3 = vcmp.eq.f32.partialorder %v313_v58, 8.507059e+37  ;;  %v332_v14 = vsel %vm329_vm9, %v331_v11, %v327_v10  ;;  %vm344_vm11 = vcmp.eq.f32.partialorder %v343_v16, 8.507059e+37  ;;  %v342_v21 = vsel %vm341_vm10, %v1175_v56, %v338_v15 }
  0xbb   :  { %v317_v1 = vsel %vm314_vm3, %v316_v63, %v312_v62  ;;  %v333_v18 = vmul.f32 %v332_v14, %v25_v13  ;;  %v347_v23 = vsel %vm344_vm11, %v346_v19, %v342_v21 }
  0xbc   :  { %v348_v27 = vmul.f32 %v347_v23, %v26_v22 }
  0xc0   :  { %371 = vxpose.xlu1.b32.cont [8/16] (narrow) %v243_v7, 16  ;;  %v318_v7 = vmul.f32 %v317_v1, %v24_v0 }
  0xc8   :  { %372 = vxpose.xlu1.b32.cont [9/16] (narrow) %v258_v20, 16  ;;  %v352_v20 = vmul.f32 %v1177_v4, %v351_v17 }
  0xca   :  { %v353_v24 = vadd.f32 %v1177_v4, %v352_v20 }
  0xcc   :  { %v357_v28 = vsel %vm356_vm14, %v1177_v4, %v353_v24 }
  0xcd   :  { %v362_v31 = vsel %vm359_vm15, %v361_v29, %v357_v28 }
  0xce   :  { %v363_v32 = vmul.f32 %v362_v31, %v27_v30 }
  0xd0   :  { %373 = vxpose.xlu1.b32.cont [10/16] (narrow) %v273_v33, 16 }
  0xd8   :  { %374 = vxpose.xlu1.b32.cont [11/16] (narrow) %v288_v46, 16 }
  0xe0   :  { %375 = vxpose.xlu1.b32.cont [12/16] (narrow) %v303_v59, 16 }
  0xe8   :  { %376 = vxpose.xlu1.b32.cont [13/16] (narrow) %v318_v7, 16 }
  0xf0   :  { %377 = vxpose.xlu1.b32.cont [14/16] (narrow) %v333_v18, 16 }
  0xf8   :  { %378 = vxpose.xlu1.b32.cont [15/16] (narrow) %v348_v27, 16 }
 0x100   :  { %379 = vxpose.xlu1.b32.end [16/16] (narrow) %v363_v32, 16 }
 0x12c   :  { %v1382_v33 = vpop.trf.xlu1 }
 0x134   :  { %v1384_v34 = vpop.trf.xlu1 }
 0x135   :  { %v396_v35 = vmax.f32 %v1382_v33, %v1384_v34 }
 0x137   :  { %v397_v36 = vrot.slane %v396_v35, 4 }
 0x139   :  { %v398_v37 = vmax.f32 %v396_v35, %v397_v36 }
 0x13b   :  { %v399_v38 = vrot.slane %v398_v37, 2 }
 0x13d   :  { %v400_v39 = vmax.f32 %v398_v37, %v399_v38 }
 0x13f   :  { %v401_v40 = vrot.slane %v400_v39, 1 }
 0x141   :  { %v402_v41 = vmax.f32 %v400_v39, %v401_v40 }
 0x143   :  { %v1104_v42 = vadd.f32 -1.0, %v402_v41 }
 0x145   :  { %v404_v43 = vsub.f32 %v402_v41, %v1104_v42 }
 0x147   :  { %v405_v44 = vmul.f32 0.25, %v404_v43 }
 0x149   :  { %v406_v45 = vadd.f32 %v1104_v42, %v405_v44  ;;  %v423_v46 = vmul.f32 2.0, %v405_v44  ;;  %v442_v47 = vmul.f32 3.0, %v405_v44  ;;  %v463_v31 = vmul.f32 0.25, %v405_v44 }
 0x14b   :  { %v407_v48 = vsub.f32 %v1382_v33, %v406_v45  ;;  %v408_v49 = vsub.f32 %v1384_v34, %v406_v45  ;;  %v424_v50 = vadd.f32 %v1104_v42, %v423_v46  ;;  %v443_v51 = vadd.f32 %v1104_v42, %v442_v47 }
 0x14c   :  { %v481_v36 = vmul.f32 2.0, %v463_v31  ;;  %v500_v37 = vmul.f32 3.0, %v463_v31 }
 0x14d   :  { %v409_v52 = vmax.f32 %v407_v48, 0.0  ;;  %v410_v53 = vmax.f32 %v408_v49, 0.0  ;;  %v425_v54 = vsub.f32 %v1382_v33, %v424_v50  ;;  %v426_v55 = vsub.f32 %v1384_v34, %v424_v50 }
 0x14e   :  { %v444_v56 = vsub.f32 %v1382_v33, %v443_v51  ;;  %v445_v57 = vsub.f32 %v1384_v34, %v443_v51 }
 0x14f   :  { %v411_v58 = vmin.f32 %v409_v52, 1.0  ;;  %v412_v59 = vmin.f32 %v410_v53, 1.0  ;;  %v427_v60 = vmax.f32 %v425_v54, 0.0  ;;  %v428_v61 = vmax.f32 %v426_v55, 0.0 }
 0x150   :  { %v446_v62 = vmax.f32 %v444_v56, 0.0  ;;  %v447_v63 = vmax.f32 %v445_v57, 0.0 }
 0x151   :  { %v413_v0 = vadd.f32 %v412_v59, %v411_v58  ;;  %v429_v1 = vmin.f32 %v427_v60, 1.0  ;;  %v430_v2 = vmin.f32 %v428_v61, 1.0 }
 0x152   :  { %v448_v3 = vmin.f32 %v446_v62, 1.0  ;;  %v449_v4 = vmin.f32 %v447_v63, 1.0 }
 0x153   :  { %v414_v5 = vrot.slane %v413_v0, 4  ;;  %v431_v6 = vadd.f32 %v430_v2, %v429_v1 }
 0x154   :  { %v450_v7 = vadd.f32 %v449_v4, %v448_v3 }
 0x155   :  { %v415_v8 = vadd.f32 %v414_v5, %v413_v0  ;;  %v432_v9 = vrot.slane %v431_v6, 4 }
 0x156   :  { %v451_v10 = vrot.slane %v450_v7, 4 }
 0x157   :  { %v416_v11 = vrot.slane %v415_v8, 2  ;;  %v433_v12 = vadd.f32 %v432_v9, %v431_v6 }
 0x158   :  { %v452_v13 = vadd.f32 %v451_v10, %v450_v7 }
 0x159   :  { %v417_v14 = vadd.f32 %v416_v11, %v415_v8  ;;  %v434_v15 = vrot.slane %v433_v12, 2 }
 0x15a   :  { %v453_v16 = vrot.slane %v452_v13, 2 }
 0x15b   :  { %v418_v17 = vrot.slane %v417_v14, 1  ;;  %v435_v18 = vadd.f32 %v434_v15, %v433_v12 }
 0x15c   :  { %v454_v19 = vadd.f32 %v453_v16, %v452_v13 }
 0x15d   :  { %v419_v20 = vadd.f32 %v418_v17, %v417_v14  ;;  %v436_v21 = vrot.slane %v435_v18, 1 }
 0x15e   :  { %v455_v22 = vrot.slane %v454_v19, 1 }
 0x15f   :  { %vm420_vm0 = vcmp.gt.f32.partialorder %v419_v20, 1.0  ;;  %v437_v23 = vadd.f32 %v436_v21, %v435_v18  ;;  %v521_v21 = vmul.f32 0.25, %v463_v31 }
 0x160   :  { %v456_v24 = vadd.f32 %v455_v22, %v454_v19  ;;  %v1105_v26 = vsel %vm420_vm0, 1.0, %v1211_v25 }
 0x161   :  { %vm438_vm1 = vcmp.gt.f32.partialorder %v437_v23, 1.0 }
 0x162   :  { %v1106_v27 = vsel %vm438_vm1, 1.0, %v1211_v25  ;;  %vm457_vm2 = vcmp.gt.f32.partialorder %v456_v24, 1.0  ;;  %v539_v24 = vmul.f32 2.0, %v521_v21 }
 0x163   :  { %v441_v28 = vadd.f32 %v1106_v27, %v1105_v26  ;;  %v1107_v29 = vsel %vm457_vm2, 1.0, %v1211_v25  ;;  %v558_v26 = vmul.f32 3.0, %v521_v21 }
 0x165   :  { %v460_v30 = vadd.f32 %v1107_v29, %v441_v28 }
 0x167   :  { %v461_v32 = vmul.f32 %v460_v30, %v405_v44 }
 0x169   :  { %v462_v35 = vadd.f32 %v1104_v42, %v461_v32 }
 0x16b   :  { %v464_v38 = vadd.f32 %v463_v31, %v462_v35  ;;  %v482_v39 = vadd.f32 %v481_v36, %v462_v35  ;;  %v501_v40 = vadd.f32 %v500_v37, %v462_v35 }
 0x16d   :  { %v465_v41 = vsub.f32 %v1382_v33, %v464_v38  ;;  %v466_v43 = vsub.f32 %v1384_v34, %v464_v38  ;;  %v483_v45 = vsub.f32 %v1382_v33, %v482_v39  ;;  %v484_v46 = vsub.f32 %v1384_v34, %v482_v39 }
 0x16e   :  { %v502_v47 = vsub.f32 %v1382_v33, %v501_v40  ;;  %v503_v48 = vsub.f32 %v1384_v34, %v501_v40 }
 0x16f   :  { %v467_v49 = vmax.f32 %v465_v41, 0.0  ;;  %v468_v44 = vmax.f32 %v466_v43, 0.0  ;;  %v485_v42 = vmax.f32 %v483_v45, 0.0  ;;  %v486_v50 = vmax.f32 %v484_v46, 0.0 }
 0x170   :  { %v504_v51 = vmax.f32 %v502_v47, 0.0  ;;  %v505_v52 = vmax.f32 %v503_v48, 0.0 }
 0x171   :  { %v469_v53 = vmin.f32 %v467_v49, 1.0  ;;  %v470_v54 = vmin.f32 %v468_v44, 1.0  ;;  %v487_v55 = vmin.f32 %v485_v42, 1.0  ;;  %v488_v56 = vmin.f32 %v486_v50, 1.0 }
 0x172   :  { %v506_v57 = vmin.f32 %v504_v51, 1.0  ;;  %v507_v58 = vmin.f32 %v505_v52, 1.0 }
 0x173   :  { %v471_v59 = vadd.f32 %v470_v54, %v469_v53  ;;  %v489_v60 = vadd.f32 %v488_v56, %v487_v55 }
 0x174   :  { %v508_v61 = vadd.f32 %v507_v58, %v506_v57 }
 0x175   :  { %v472_v62 = vrot.slane %v471_v59, 4  ;;  %v490_v63 = vrot.slane %v489_v60, 4 }
 0x176   :  { %v509_v0 = vrot.slane %v508_v61, 4 }
 0x177   :  { %v473_v1 = vadd.f32 %v472_v62, %v471_v59  ;;  %v491_v2 = vadd.f32 %v490_v63, %v489_v60 }
 0x178   :  { %v510_v3 = vadd.f32 %v509_v0, %v508_v61 }
 0x179   :  { %v474_v4 = vrot.slane %v473_v1, 2  ;;  %v492_v5 = vrot.slane %v491_v2, 2 }
 0x17a   :  { %v511_v6 = vrot.slane %v510_v3, 2 }
 0x17b   :  { %v475_v7 = vadd.f32 %v474_v4, %v473_v1  ;;  %v493_v8 = vadd.f32 %v492_v5, %v491_v2 }
 0x17c   :  { %v512_v9 = vadd.f32 %v511_v6, %v510_v3 }
 0x17d   :  { %v476_v10 = vrot.slane %v475_v7, 1  ;;  %v494_v11 = vrot.slane %v493_v8, 1 }
 0x17e   :  { %v513_v12 = vrot.slane %v512_v9, 1 }
 0x17f   :  { %v477_v13 = vadd.f32 %v476_v10, %v475_v7  ;;  %v495_v14 = vadd.f32 %v494_v11, %v493_v8 }
 0x180   :  { %v514_v15 = vadd.f32 %v513_v12, %v512_v9  ;;  %v579_v12 = vmul.f32 0.25, %v521_v21 }
 0x181   :  { %vm478_vm3 = vcmp.gt.f32.partialorder %v477_v13, 1.0  ;;  %vm496_vm4 = vcmp.gt.f32.partialorder %v495_v14, 1.0 }
 0x182   :  { %v1108_v16 = vsel %vm478_vm3, 1.0, %v1211_v25  ;;  %v1109_v17 = vsel %vm496_vm4, 1.0, %v1211_v25  ;;  %vm515_vm5 = vcmp.gt.f32.partialorder %v514_v15, 1.0  ;;  %v597_v15 = vmul.f32 2.0, %v579_v12 }
 0x183   :  { %v499_v18 = vadd.f32 %v1109_v17, %v1108_v16  ;;  %v1110_v19 = vsel %vm515_vm5, 1.0, %v1211_v25  ;;  %v616_v16 = vmul.f32 3.0, %v579_v12 }
 0x185   :  { %v518_v20 = vadd.f32 %v1110_v19, %v499_v18 }
 0x187   :  { %v519_v22 = vmul.f32 %v518_v20, %v463_v31 }
 0x189   :  { %v520_v23 = vadd.f32 %v519_v22, %v462_v35 }
 0x18b   :  { %v522_v27 = vadd.f32 %v521_v21, %v520_v23  ;;  %v540_v28 = vadd.f32 %v539_v24, %v520_v23  ;;  %v559_v29 = vadd.f32 %v558_v26, %v520_v23 }
 0x18d   :  { %v523_v30 = vsub.f32 %v1382_v33, %v522_v27  ;;  %v524_v32 = vsub.f32 %v1384_v34, %v522_v27  ;;  %v541_v36 = vsub.f32 %v1382_v33, %v540_v28  ;;  %v542_v37 = vsub.f32 %v1384_v34, %v540_v28 }
 0x18e   :  { %v560_v38 = vsub.f32 %v1382_v33, %v559_v29  ;;  %v561_v39 = vsub.f32 %v1384_v34, %v559_v29 }
 0x18f   :  { %v525_v40 = vmax.f32 %v523_v30, 0.0  ;;  %v526_v31 = vmax.f32 %v524_v32, 0.0  ;;  %v543_v35 = vmax.f32 %v541_v36, 0.0  ;;  %v544_v41 = vmax.f32 %v542_v37, 0.0 }
 0x190   :  { %v562_v43 = vmax.f32 %v560_v38, 0.0  ;;  %v563_v45 = vmax.f32 %v561_v39, 0.0 }
 0x191   :  { %v527_v46 = vmin.f32 %v525_v40, 1.0  ;;  %v528_v47 = vmin.f32 %v526_v31, 1.0  ;;  %v545_v48 = vmin.f32 %v543_v35, 1.0  ;;  %v546_v49 = vmin.f32 %v544_v41, 1.0 }
 0x192   :  { %v564_v44 = vmin.f32 %v562_v43, 1.0  ;;  %v565_v42 = vmin.f32 %v563_v45, 1.0 }
 0x193   :  { %v529_v50 = vadd.f32 %v528_v47, %v527_v46  ;;  %v547_v51 = vadd.f32 %v546_v49, %v545_v48 }
 0x194   :  { %v566_v52 = vadd.f32 %v565_v42, %v564_v44 }
 0x195   :  { %v530_v53 = vrot.slane %v529_v50, 4  ;;  %v548_v54 = vrot.slane %v547_v51, 4 }
 0x196   :  { %v567_v55 = vrot.slane %v566_v52, 4 }
 0x197   :  { %v531_v56 = vadd.f32 %v530_v53, %v529_v50  ;;  %v549_v57 = vadd.f32 %v548_v54, %v547_v51 }
 0x198   :  { %v568_v58 = vadd.f32 %v567_v55, %v566_v52 }
 0x199   :  { %v532_v59 = vrot.slane %v531_v56, 2  ;;  %v550_v60 = vrot.slane %v549_v57, 2 }
 0x19a   :  { %v569_v61 = vrot.slane %v568_v58, 2 }
 0x19b   :  { %v533_v62 = vadd.f32 %v532_v59, %v531_v56  ;;  %v551_v63 = vadd.f32 %v550_v60, %v549_v57 }
 0x19c   :  { %v570_v0 = vadd.f32 %v569_v61, %v568_v58 }
 0x19d   :  { %v534_v1 = vrot.slane %v533_v62, 1  ;;  %v552_v2 = vrot.slane %v551_v63, 1 }
 0x19e   :  { %v571_v3 = vrot.slane %v570_v0, 1 }
 0x19f   :  { %v535_v4 = vadd.f32 %v534_v1, %v533_v62  ;;  %v553_v5 = vadd.f32 %v552_v2, %v551_v63 }
 0x1a0   :  { %v572_v6 = vadd.f32 %v571_v3, %v570_v0  ;;  %v637_v3 = vmul.f32 0.25, %v579_v12 }
 0x1a1   :  { %vm536_vm6 = vcmp.gt.f32.partialorder %v535_v4, 1.0  ;;  %vm554_vm7 = vcmp.gt.f32.partialorder %v553_v5, 1.0 }
 0x1a2   :  { %v1111_v7 = vsel %vm536_vm6, 1.0, %v1211_v25  ;;  %v1112_v8 = vsel %vm554_vm7, 1.0, %v1211_v25  ;;  %vm573_vm8 = vcmp.gt.f32.partialorder %v572_v6, 1.0  ;;  %v655_v6 = vmul.f32 2.0, %v637_v3 }
 0x1a3   :  { %v557_v9 = vadd.f32 %v1112_v8, %v1111_v7  ;;  %v1113_v10 = vsel %vm573_vm8, 1.0, %v1211_v25  ;;  %v674_v7 = vmul.f32 3.0, %v637_v3 }
 0x1a5   :  { %v576_v11 = vadd.f32 %v1113_v10, %v557_v9 }
 0x1a7   :  { %v577_v13 = vmul.f32 %v576_v11, %v521_v21 }
 0x1a9   :  { %v578_v14 = vadd.f32 %v577_v13, %v520_v23 }
 0x1ab   :  { %v580_v17 = vadd.f32 %v579_v12, %v578_v14  ;;  %v598_v18 = vadd.f32 %v597_v15, %v578_v14  ;;  %v617_v19 = vadd.f32 %v616_v16, %v578_v14 }
 0x1ad   :  { %v581_v20 = vsub.f32 %v1382_v33, %v580_v17  ;;  %v582_v22 = vsub.f32 %v1384_v34, %v580_v17  ;;  %v599_v24 = vsub.f32 %v1382_v33, %v598_v18  ;;  %v600_v26 = vsub.f32 %v1384_v34, %v598_v18 }
 0x1ae   :  { %v618_v27 = vsub.f32 %v1382_v33, %v617_v19  ;;  %v619_v28 = vsub.f32 %v1384_v34, %v617_v19 }
 0x1af   :  { %v583_v29 = vmax.f32 %v581_v20, 0.0  ;;  %v584_v21 = vmax.f32 %v582_v22, 0.0  ;;  %v601_v23 = vmax.f32 %v599_v24, 0.0  ;;  %v602_v30 = vmax.f32 %v600_v26, 0.0 }
 0x1b0   :  { %v620_v32 = vmax.f32 %v618_v27, 0.0  ;;  %v621_v36 = vmax.f32 %v619_v28, 0.0 }
 0x1b1   :  { %v585_v37 = vmin.f32 %v583_v29, 1.0  ;;  %v586_v38 = vmin.f32 %v584_v21, 1.0  ;;  %v603_v39 = vmin.f32 %v601_v23, 1.0  ;;  %v604_v40 = vmin.f32 %v602_v30, 1.0 }
 0x1b2   :  { %v622_v31 = vmin.f32 %v620_v32, 1.0  ;;  %v623_v35 = vmin.f32 %v621_v36, 1.0 }
 0x1b3   :  { %v587_v41 = vadd.f32 %v586_v38, %v585_v37  ;;  %v605_v43 = vadd.f32 %v604_v40, %v603_v39 }
 0x1b4   :  { %v624_v45 = vadd.f32 %v623_v35, %v622_v31 }
 0x1b5   :  { %v588_v46 = vrot.slane %v587_v41, 4  ;;  %v606_v47 = vrot.slane %v605_v43, 4 }
 0x1b6   :  { %v625_v48 = vrot.slane %v624_v45, 4 }
 0x1b7   :  { %v589_v49 = vadd.f32 %v588_v46, %v587_v41  ;;  %v607_v44 = vadd.f32 %v606_v47, %v605_v43 }
 0x1b8   :  { %v626_v42 = vadd.f32 %v625_v48, %v624_v45 }
 0x1b9   :  { %v590_v50 = vrot.slane %v589_v49, 2  ;;  %v608_v51 = vrot.slane %v607_v44, 2 }
 0x1ba   :  { %v627_v52 = vrot.slane %v626_v42, 2 }
 0x1bb   :  { %v591_v53 = vadd.f32 %v590_v50, %v589_v49  ;;  %v609_v54 = vadd.f32 %v608_v51, %v607_v44 }
 0x1bc   :  { %v628_v55 = vadd.f32 %v627_v52, %v626_v42 }
 0x1bd   :  { %v592_v56 = vrot.slane %v591_v53, 1  ;;  %v610_v57 = vrot.slane %v609_v54, 1 }
 0x1be   :  { %v629_v58 = vrot.slane %v628_v55, 1 }
 0x1bf   :  { %v593_v59 = vadd.f32 %v592_v56, %v591_v53  ;;  %v611_v60 = vadd.f32 %v610_v57, %v609_v54 }
 0x1c0   :  { %v630_v61 = vadd.f32 %v629_v58, %v628_v55  ;;  %v695_v58 = vmul.f32 0.25, %v637_v3 }
 0x1c1   :  { %vm594_vm9 = vcmp.gt.f32.partialorder %v593_v59, 1.0  ;;  %vm612_vm10 = vcmp.gt.f32.partialorder %v611_v60, 1.0 }
 0x1c2   :  { %v1114_v62 = vsel %vm594_vm9, 1.0, %v1211_v25  ;;  %v1115_v63 = vsel %vm612_vm10, 1.0, %v1211_v25  ;;  %vm631_vm11 = vcmp.gt.f32.partialorder %v630_v61, 1.0  ;;  %v713_v61 = vmul.f32 2.0, %v695_v58 }
 0x1c3   :  { %v615_v0 = vadd.f32 %v1115_v63, %v1114_v62  ;;  %v1116_v1 = vsel %vm631_vm11, 1.0, %v1211_v25  ;;  %v732_v62 = vmul.f32 3.0, %v695_v58 }
 0x1c5   :  { %v634_v2 = vadd.f32 %v1116_v1, %v615_v0 }
 0x1c7   :  { %v635_v4 = vmul.f32 %v634_v2, %v579_v12 }
 0x1c9   :  { %v636_v5 = vadd.f32 %v635_v4, %v578_v14 }
 0x1cb   :  { %v638_v8 = vadd.f32 %v637_v3, %v636_v5  ;;  %v656_v9 = vadd.f32 %v655_v6, %v636_v5  ;;  %v675_v10 = vadd.f32 %v674_v7, %v636_v5 }
 0x1cd   :  { %v639_v11 = vsub.f32 %v1382_v33, %v638_v8  ;;  %v640_v13 = vsub.f32 %v1384_v34, %v638_v8  ;;  %v657_v15 = vsub.f32 %v1382_v33, %v656_v9  ;;  %v658_v16 = vsub.f32 %v1384_v34, %v656_v9 }
 0x1ce   :  { %v676_v17 = vsub.f32 %v1382_v33, %v675_v10  ;;  %v677_v18 = vsub.f32 %v1384_v34, %v675_v10 }
 0x1cf   :  { %v641_v19 = vmax.f32 %v639_v11, 0.0  ;;  %v642_v12 = vmax.f32 %v640_v13, 0.0  ;;  %v659_v14 = vmax.f32 %v657_v15, 0.0  ;;  %v660_v20 = vmax.f32 %v658_v16, 0.0 }
 0x1d0   :  { %v678_v22 = vmax.f32 %v676_v17, 0.0  ;;  %v679_v24 = vmax.f32 %v677_v18, 0.0 }
 0x1d1   :  { %v643_v26 = vmin.f32 %v641_v19, 1.0  ;;  %v644_v27 = vmin.f32 %v642_v12, 1.0  ;;  %v661_v28 = vmin.f32 %v659_v14, 1.0  ;;  %v662_v29 = vmin.f32 %v660_v20, 1.0 }
 0x1d2   :  { %v680_v21 = vmin.f32 %v678_v22, 1.0  ;;  %v681_v23 = vmin.f32 %v679_v24, 1.0 }
 0x1d3   :  { %v645_v30 = vadd.f32 %v644_v27, %v643_v26  ;;  %v663_v32 = vadd.f32 %v662_v29, %v661_v28 }
 0x1d4   :  { %v682_v36 = vadd.f32 %v681_v23, %v680_v21 }
 0x1d5   :  { %v646_v37 = vrot.slane %v645_v30, 4  ;;  %v664_v38 = vrot.slane %v663_v32, 4 }
 0x1d6   :  { %v683_v39 = vrot.slane %v682_v36, 4 }
 0x1d7   :  { %v647_v40 = vadd.f32 %v646_v37, %v645_v30  ;;  %v665_v31 = vadd.f32 %v664_v38, %v663_v32 }
 0x1d8   :  { %v684_v35 = vadd.f32 %v683_v39, %v682_v36 }
 0x1d9   :  { %v648_v41 = vrot.slane %v647_v40, 2  ;;  %v666_v43 = vrot.slane %v665_v31, 2 }
 0x1da   :  { %v685_v45 = vrot.slane %v684_v35, 2 }
 0x1db   :  { %v649_v46 = vadd.f32 %v648_v41, %v647_v40  ;;  %v667_v47 = vadd.f32 %v666_v43, %v665_v31 }
 0x1dc   :  { %v686_v48 = vadd.f32 %v685_v45, %v684_v35 }
 0x1dd   :  { %v650_v49 = vrot.slane %v649_v46, 1  ;;  %v668_v44 = vrot.slane %v667_v47, 1 }
 0x1de   :  { %v687_v42 = vrot.slane %v686_v48, 1 }
 0x1df   :  { %v651_v50 = vadd.f32 %v650_v49, %v649_v46  ;;  %v669_v51 = vadd.f32 %v668_v44, %v667_v47 }
 0x1e0   :  { %v688_v52 = vadd.f32 %v687_v42, %v686_v48  ;;  %v753_v42 = vmul.f32 0.25, %v695_v58 }
 0x1e1   :  { %vm652_vm12 = vcmp.gt.f32.partialorder %v651_v50, 1.0  ;;  %vm670_vm13 = vcmp.gt.f32.partialorder %v669_v51, 1.0 }
 0x1e2   :  { %v1117_v53 = vsel %vm652_vm12, 1.0, %v1211_v25  ;;  %v1118_v54 = vsel %vm670_vm13, 1.0, %v1211_v25  ;;  %vm689_vm14 = vcmp.gt.f32.partialorder %v688_v52, 1.0  ;;  %v771_v52 = vmul.f32 2.0, %v753_v42 }
 0x1e3   :  { %v673_v55 = vadd.f32 %v1118_v54, %v1117_v53  ;;  %v1119_v56 = vsel %vm689_vm14, 1.0, %v1211_v25  ;;  %v790_v53 = vmul.f32 3.0, %v753_v42 }
 0x1e5   :  { %v692_v57 = vadd.f32 %v1119_v56, %v673_v55 }
 0x1e7   :  { %v693_v59 = vmul.f32 %v692_v57, %v637_v3 }
 0x1e9   :  { %v694_v60 = vadd.f32 %v693_v59, %v636_v5 }
 0x1eb   :  { %v696_v63 = vadd.f32 %v695_v58, %v694_v60  ;;  %v714_v0 = vadd.f32 %v713_v61, %v694_v60  ;;  %v733_v1 = vadd.f32 %v732_v62, %v694_v60 }
 0x1ed   :  { %v697_v2 = vsub.f32 %v1382_v33, %v696_v63  ;;  %v698_v4 = vsub.f32 %v1384_v34, %v696_v63  ;;  %v715_v6 = vsub.f32 %v1382_v33, %v714_v0  ;;  %v716_v7 = vsub.f32 %v1384_v34, %v714_v0 }
 0x1ee   :  { %v734_v8 = vsub.f32 %v1382_v33, %v733_v1  ;;  %v735_v9 = vsub.f32 %v1384_v34, %v733_v1 }
 0x1ef   :  { %v699_v10 = vmax.f32 %v697_v2, 0.0  ;;  %v700_v3 = vmax.f32 %v698_v4, 0.0  ;;  %v717_v5 = vmax.f32 %v715_v6, 0.0  ;;  %v718_v11 = vmax.f32 %v716_v7, 0.0 }
 0x1f0   :  { %v736_v13 = vmax.f32 %v734_v8, 0.0  ;;  %v737_v15 = vmax.f32 %v735_v9, 0.0 }
 0x1f1   :  { %v701_v16 = vmin.f32 %v699_v10, 1.0  ;;  %v702_v17 = vmin.f32 %v700_v3, 1.0  ;;  %v719_v18 = vmin.f32 %v717_v5, 1.0  ;;  %v720_v19 = vmin.f32 %v718_v11, 1.0 }
 0x1f2   :  { %v738_v12 = vmin.f32 %v736_v13, 1.0  ;;  %v739_v14 = vmin.f32 %v737_v15, 1.0 }
 0x1f3   :  { %v703_v20 = vadd.f32 %v702_v17, %v701_v16  ;;  %v721_v22 = vadd.f32 %v720_v19, %v719_v18 }
 0x1f4   :  { %v740_v24 = vadd.f32 %v739_v14, %v738_v12 }
 0x1f5   :  { %v704_v26 = vrot.slane %v703_v20, 4  ;;  %v722_v27 = vrot.slane %v721_v22, 4 }
 0x1f6   :  { %v741_v28 = vrot.slane %v740_v24, 4 }
 0x1f7   :  { %v705_v29 = vadd.f32 %v704_v26, %v703_v20  ;;  %v723_v21 = vadd.f32 %v722_v27, %v721_v22 }
 0x1f8   :  { %v742_v23 = vadd.f32 %v741_v28, %v740_v24 }
 0x1f9   :  { %v706_v30 = vrot.slane %v705_v29, 2  ;;  %v724_v32 = vrot.slane %v723_v21, 2 }
 0x1fa   :  { %v743_v36 = vrot.slane %v742_v23, 2 }
 0x1fb   :  { %v707_v37 = vadd.f32 %v706_v30, %v705_v29  ;;  %v725_v38 = vadd.f32 %v724_v32, %v723_v21 }
 0x1fc   :  { %v744_v39 = vadd.f32 %v743_v36, %v742_v23 }
 0x1fd   :  { %v708_v40 = vrot.slane %v707_v37, 1  ;;  %v726_v31 = vrot.slane %v725_v38, 1 }
 0x1fe   :  { %v745_v35 = vrot.slane %v744_v39, 1 }
 0x1ff   :  { %v709_v41 = vadd.f32 %v708_v40, %v707_v37  ;;  %v727_v43 = vadd.f32 %v726_v31, %v725_v38 }
 0x200   :  { %v746_v45 = vadd.f32 %v745_v35, %v744_v39  ;;  %v1451_v35 = vmul.f32 0.25, %v753_v42 }
 0x201   :  { %vm710_vm15 = vcmp.gt.f32.partialorder %v709_v41, 1.0  ;;  %vm728_vm0 = vcmp.gt.f32.partialorder %v727_v43, 1.0 }
 0x202   :  { %v1120_v46 = vsel %vm710_vm15, 1.0, %v1211_v25  ;;  %v1121_v47 = vsel %vm728_vm0, 1.0, %v1211_v25  ;;  %vm747_vm1 = vcmp.gt.f32.partialorder %v746_v45, 1.0  ;;  %v829_v45 = vmul.f32 2.0, %v1451_v35 }
 0x203   :  { %v731_v48 = vadd.f32 %v1121_v47, %v1120_v46  ;;  %v1122_v49 = vsel %vm747_vm1, 1.0, %v1211_v25  ;;  %v848_v46 = vmul.f32 3.0, %v1451_v35 }
 0x205   :  { %v750_v44 = vadd.f32 %v1122_v49, %v731_v48 }
 0x207   :  { %v751_v50 = vmul.f32 %v750_v44, %v695_v58 }
 0x209   :  { %v752_v51 = vadd.f32 %v751_v50, %v694_v60 }
 0x20b   :  { %v754_v54 = vadd.f32 %v753_v42, %v752_v51  ;;  %v772_v55 = vadd.f32 %v771_v52, %v752_v51  ;;  %v791_v56 = vadd.f32 %v790_v53, %v752_v51 }
 0x20d   :  { %v755_v57 = vsub.f32 %v1382_v33, %v754_v54  ;;  %v756_v59 = vsub.f32 %v1384_v34, %v754_v54  ;;  %v773_v61 = vsub.f32 %v1382_v33, %v772_v55  ;;  %v774_v62 = vsub.f32 %v1384_v34, %v772_v55 }
 0x20e   :  { %v792_v63 = vsub.f32 %v1382_v33, %v791_v56  ;;  %v793_v0 = vsub.f32 %v1384_v34, %v791_v56 }
 0x20f   :  { %v757_v1 = vmax.f32 %v755_v57, 0.0  ;;  %v758_v58 = vmax.f32 %v756_v59, 0.0  ;;  %v775_v60 = vmax.f32 %v773_v61, 0.0  ;;  %v776_v2 = vmax.f32 %v774_v62, 0.0 }
 0x210   :  { %v794_v4 = vmax.f32 %v792_v63, 0.0  ;;  %v795_v6 = vmax.f32 %v793_v0, 0.0 }
 0x211   :  { %v759_v7 = vmin.f32 %v757_v1, 1.0  ;;  %v760_v8 = vmin.f32 %v758_v58, 1.0  ;;  %v777_v9 = vmin.f32 %v775_v60, 1.0  ;;  %v778_v10 = vmin.f32 %v776_v2, 1.0 }
 0x212   :  { %v796_v3 = vmin.f32 %v794_v4, 1.0  ;;  %v797_v5 = vmin.f32 %v795_v6, 1.0 }
 0x213   :  { %v761_v11 = vadd.f32 %v760_v8, %v759_v7  ;;  %v779_v13 = vadd.f32 %v778_v10, %v777_v9 }
 0x214   :  { %v798_v15 = vadd.f32 %v797_v5, %v796_v3 }
 0x215   :  { %v762_v16 = vrot.slane %v761_v11, 4  ;;  %v780_v17 = vrot.slane %v779_v13, 4 }
 0x216   :  { %v799_v18 = vrot.slane %v798_v15, 4 }
 0x217   :  { %v763_v19 = vadd.f32 %v762_v16, %v761_v11  ;;  %v781_v12 = vadd.f32 %v780_v17, %v779_v13 }
 0x218   :  { %v800_v14 = vadd.f32 %v799_v18, %v798_v15 }
 0x219   :  { %v764_v20 = vrot.slane %v763_v19, 2  ;;  %v782_v22 = vrot.slane %v781_v12, 2 }
 0x21a   :  { %v801_v24 = vrot.slane %v800_v14, 2 }
 0x21b   :  { %v765_v26 = vadd.f32 %v764_v20, %v763_v19  ;;  %v783_v27 = vadd.f32 %v782_v22, %v781_v12 }
 0x21c   :  { %v802_v28 = vadd.f32 %v801_v24, %v800_v14 }
 0x21d   :  { %v766_v29 = vrot.slane %v765_v26, 1  ;;  %v784_v21 = vrot.slane %v783_v27, 1 }
 0x21e   :  { %v803_v23 = vrot.slane %v802_v28, 1 }
 0x21f   :  { %v767_v30 = vadd.f32 %v766_v29, %v765_v26  ;;  %v785_v32 = vadd.f32 %v784_v21, %v783_v27 }
 0x220   :  { %v804_v36 = vadd.f32 %v803_v23, %v802_v28 }
 0x221   :  { %vm768_vm2 = vcmp.gt.f32.partialorder %v767_v30, 1.0  ;;  %vm786_vm3 = vcmp.gt.f32.partialorder %v785_v32, 1.0  ;;  %v870_v32 = vmul.f32 0.5, %v1451_v35 }
 0x222   :  { %v1123_v37 = vsel %vm768_vm2, 1.0, %v1211_v25  ;;  %v1124_v38 = vsel %vm786_vm3, 1.0, %v1211_v25  ;;  %vm805_vm4 = vcmp.gt.f32.partialorder %v804_v36, 1.0 }
 0x223   :  { %v789_v39 = vadd.f32 %v1124_v38, %v1123_v37  ;;  %v1125_v40 = vsel %vm805_vm4, 1.0, %v1211_v25 }
 0x225   :  { %v808_v31 = vadd.f32 %v1125_v40, %v789_v39 }
 0x227   :  { %v809_v41 = vmul.f32 %v808_v31, %v753_v42 }
 0x229   :  { %v810_v43 = vadd.f32 %v809_v41, %v752_v51 }
 0x22b   :  { %v812_v47 = vadd.f32 %v1451_v35, %v810_v43  ;;  %v830_v48 = vadd.f32 %v829_v45, %v810_v43  ;;  %v849_v49 = vadd.f32 %v848_v46, %v810_v43 }
 0x22d   :  { %v813_v44 = vsub.f32 %v1382_v33, %v812_v47  ;;  %v814_v50 = vsub.f32 %v1384_v34, %v812_v47  ;;  %v831_v52 = vsub.f32 %v1382_v33, %v830_v48  ;;  %v832_v53 = vsub.f32 %v1384_v34, %v830_v48 }
 0x22e   :  { %v850_v54 = vsub.f32 %v1382_v33, %v849_v49  ;;  %v851_v42 = vsub.f32 %v1384_v34, %v849_v49 }
 0x22f   :  { %v815_v51 = vmax.f32 %v813_v44, 0.0  ;;  %v816_v55 = vmax.f32 %v814_v50, 0.0  ;;  %v833_v56 = vmax.f32 %v831_v52, 0.0  ;;  %v834_v57 = vmax.f32 %v832_v53, 0.0 }
 0x230   :  { %v852_v59 = vmax.f32 %v850_v54, 0.0  ;;  %v853_v61 = vmax.f32 %v851_v42, 0.0 }
 0x231   :  { %v817_v62 = vmin.f32 %v815_v51, 1.0  ;;  %v818_v63 = vmin.f32 %v816_v55, 1.0  ;;  %v835_v0 = vmin.f32 %v833_v56, 1.0  ;;  %v836_v1 = vmin.f32 %v834_v57, 1.0 }
 0x232   :  { %v854_v58 = vmin.f32 %v852_v59, 1.0  ;;  %v855_v60 = vmin.f32 %v853_v61, 1.0 }
 0x233   :  { %v819_v2 = vadd.f32 %v818_v63, %v817_v62  ;;  %v837_v4 = vadd.f32 %v836_v1, %v835_v0 }
 0x234   :  { %v856_v6 = vadd.f32 %v855_v60, %v854_v58 }
 0x235   :  { %v820_v7 = vrot.slane %v819_v2, 4  ;;  %v838_v8 = vrot.slane %v837_v4, 4 }
 0x236   :  { %v857_v9 = vrot.slane %v856_v6, 4 }
 0x237   :  { %v821_v10 = vadd.f32 %v820_v7, %v819_v2  ;;  %v839_v3 = vadd.f32 %v838_v8, %v837_v4 }
 0x238   :  { %v858_v5 = vadd.f32 %v857_v9, %v856_v6 }
 0x239   :  { %v822_v11 = vrot.slane %v821_v10, 2  ;;  %v840_v13 = vrot.slane %v839_v3, 2 }
 0x23a   :  { %v859_v15 = vrot.slane %v858_v5, 2 }
 0x23b   :  { %v823_v16 = vadd.f32 %v822_v11, %v821_v10  ;;  %v841_v17 = vadd.f32 %v840_v13, %v839_v3 }
 0x23c   :  { %v860_v18 = vadd.f32 %v859_v15, %v858_v5 }
 0x23d   :  { %v824_v19 = vrot.slane %v823_v16, 1  ;;  %v842_v12 = vrot.slane %v841_v17, 1 }
 0x23e   :  { %v861_v14 = vrot.slane %v860_v18, 1 }
 0x23f   :  { %v825_v20 = vadd.f32 %v824_v19, %v823_v16  ;;  %v843_v22 = vadd.f32 %v842_v12, %v841_v17 }
 0x240   :  { %v862_v24 = vadd.f32 %v861_v14, %v860_v18 }
 0x241   :  { %vm826_vm5 = vcmp.gt.f32.partialorder %v825_v20, 1.0  ;;  %vm844_vm6 = vcmp.gt.f32.partialorder %v843_v22, 1.0 }
 0x242   :  { %v1126_v26 = vsel %vm826_vm5, 1.0, %v1211_v25  ;;  %v1127_v27 = vsel %vm844_vm6, 1.0, %v1211_v25  ;;  %vm863_vm7 = vcmp.gt.f32.partialorder %v862_v24, 1.0 }
 0x243   :  { %v847_v28 = vadd.f32 %v1127_v27, %v1126_v26  ;;  %v1128_v29 = vsel %vm863_vm7, 1.0, %v1211_v25 }
 0x245   :  { %v866_v21 = vadd.f32 %v1128_v29, %v847_v28 }
 0x247   :  { %v867_v23 = vmul.f32 %v866_v21, %v1451_v35 }
 0x249   :  { %v868_v30 = vadd.f32 %v867_v23, %v810_v43 }
 0x24b   :  { %v871_v36 = vadd.f32 %v870_v32, %v868_v30  ;;  %v869_v10 = vadd.f32 %v868_v30, %v1451_v35 }
 0x24d   :  { %v872_v37 = vsub.f32 %v1382_v33, %v871_v36  ;;  %v873_v38 = vsub.f32 %v1384_v34, %v871_v36 }
 0x24f   :  { %v874_v39 = vmax.f32 %v872_v37, 0.0  ;;  %v875_v40 = vmax.f32 %v873_v38, 0.0  ;;  %vm885_vm8 = vcmp.gt.f32.partialorder %v872_v37, 0.0  ;;  %vm886_vm9 = vcmp.gt.f32.partialorder %v873_v38, 0.0 }
 0x250   :  { %vm887_vm10 = vcmp.lt.f32.partialorder %v872_v37, 1.0  ;;  %vm888_vm11 = vcmp.lt.f32.partialorder %v873_v38, 1.0 }
 0x251   :  { %vm889_vm12 = vmand %vm885_vm8, %vm887_vm10  ;;  %v876_v41 = vmin.f32 %v874_v39, 1.0  ;;  %v877_v45 = vmin.f32 %v875_v40, 1.0 }
 0x252   :  { %vm890_vm13 = vmand %vm886_vm9, %vm888_vm11  ;;  %v1129_v31 = vsel %vm889_vm12, 1.0, %v1211_v25 }
 0x253   :  { %v1130_v43 = vsel %vm890_vm13, 1.0, %v1211_v25  ;;  %v878_v48 = vadd.f32 %v877_v45, %v876_v41 }
 0x254   :  { %v895_v46 = vadd.f32 %v1130_v43, %v1129_v31 }
 0x255   :  { %v879_v50 = vrot.slane %v878_v48, 4 }
 0x256   :  { %v896_v47 = vrot.slane %v895_v46, 4 }
 0x257   :  { %v880_v54 = vadd.f32 %v879_v50, %v878_v48 }
 0x258   :  { %v897_v49 = vadd.f32 %v896_v47, %v895_v46 }
 0x259   :  { %v881_v55 = vrot.slane %v880_v54, 2 }
 0x25a   :  { %v898_v44 = vrot.slane %v897_v49, 2 }
 0x25b   :  { %v882_v56 = vadd.f32 %v881_v55, %v880_v54 }
 0x25c   :  { %v899_v52 = vadd.f32 %v898_v44, %v897_v49 }
 0x25d   :  { %v883_v59 = vrot.slane %v882_v56, 1 }
 0x25e   :  { %v900_v53 = vrot.slane %v899_v52, 1 }
 0x25f   :  { %v884_v0 = vadd.f32 %v883_v59, %v882_v56 }
 0x260   :  { %v901_v42 = vadd.f32 %v900_v53, %v899_v52 }
 0x261   :  { %v1131_v4 = vadd.f32 -1.0, %v884_v0  ;;  %vm902_vm2 = vcmp.gt.f32.partialorder %v884_v0, 1.0 }
 0x262   :  { %v906_v51 = vmax.f32 %v901_v42, 1.0  ;;  %v903_v3 = vsel %vm902_vm2, %v871_v36, %v868_v30  ;;  %v904_v11 = vsel %vm902_vm2, %v869_v10, %v871_v36 }
 0x264   :  { %1178 = vrcp.f32 %v906_v51  ;;  %v918_v63 = vand.u32 2147483648, %v906_v51  ;;  %v916_v58 = vand.u32 2147483647, %v906_v51  ;;  %vm912_vm15 = vweird.f32 %v906_v51 }
 0x266   :  { %v919_v2 = vor.u32 1.1754944e-38, %v918_v63  ;;  %vm917_vm1 = vcmp.eq.f32.partialorder %v916_v58, 8.507059e+37 }
 0x26a   :  { %v1179_v57 = vpop.eup %1178 }
 0x26b   :  { %v908_v61 = vmul.f32 %v1179_v57, %v906_v51  ;;  %vm913_vm14 = vweird.f32 %v1179_v57 }
 0x26c   :  { %vm914_vm0 = vmor %vm912_vm15, %vm913_vm14 }
 0x26d   :  { %v909_v62 = vsub.f32 1.0, %v908_v61 }
 0x26f   :  { %v910_v1 = vmul.f32 %v1179_v57, %v909_v62 }
 0x271   :  { %v911_v60 = vadd.f32 %v1179_v57, %v910_v1 }
 0x273   :  { %v915_v6 = vsel %vm914_vm0, %v1179_v57, %v911_v60 }
 0x274   :  { %v920_v7 = vsel %vm917_vm1, %v919_v2, %v915_v6 }
 0x275   :  { %v921_v8 = vmul.f32 %v1131_v4, %v920_v7 }
 0x277   :  { %v922_v9 = vadd.f32 %v921_v8, %v871_v36 }
 0x279   :  { %v923_v5 = vmax.f32 %v903_v3, %v922_v9 }
 0x27b   :  { %v924_v13 = vmin.f32 %v904_v11, %v923_v5 }
 0x27d   :  { %v925_v15 = vsub.f32 %v1382_v33, %v924_v13  ;;  %v926_v16 = vsub.f32 %v1384_v34, %v924_v13 }
 0x27f   :  { %v927_v17 = vmax.f32 %v925_v15, 0.0  ;;  %v928_v18 = vmax.f32 %v926_v16, 0.0  ;;  %vm938_vm3 = vcmp.gt.f32.partialorder %v925_v15, 0.0  ;;  %vm939_vm4 = vcmp.gt.f32.partialorder %v926_v16, 0.0 }
 0x280   :  { %vm940_vm5 = vcmp.lt.f32.partialorder %v925_v15, 1.0  ;;  %vm941_vm6 = vcmp.lt.f32.partialorder %v926_v16, 1.0 }
 0x281   :  { %vm942_vm7 = vmand %vm938_vm3, %vm940_vm5  ;;  %v929_v12 = vmin.f32 %v927_v17, 1.0  ;;  %v930_v35 = vmin.f32 %v928_v18, 1.0 }
 0x282   :  { %vm943_vm8 = vmand %vm939_vm4, %vm941_vm6  ;;  %v1132_v19 = vsel %vm942_vm7, 1.0, %v1211_v25 }
 0x283   :  { %v1133_v14 = vsel %vm943_vm8, 1.0, %v1211_v25  ;;  %v931_v24 = vadd.f32 %v930_v35, %v929_v12 }
 0x284   :  { %v948_v20 = vadd.f32 %v1133_v14, %v1132_v19 }
 0x285   :  { %v932_v28 = vrot.slane %v931_v24, 4 }
 0x286   :  { %v949_v22 = vrot.slane %v948_v20, 4 }
 0x287   :  { %v933_v23 = vadd.f32 %v932_v28, %v931_v24 }
 0x288   :  { %v950_v26 = vadd.f32 %v949_v22, %v948_v20 }
 0x289   :  { %v934_v36 = vrot.slane %v933_v23, 2 }
 0x28a   :  { %v951_v27 = vrot.slane %v950_v26, 2 }
 0x28b   :  { %v935_v37 = vadd.f32 %v934_v36, %v933_v23 }
 0x28c   :  { %v952_v29 = vadd.f32 %v951_v27, %v950_v26 }
 0x28d   :  { %v936_v39 = vrot.slane %v935_v37, 1 }
 0x28e   :  { %v953_v21 = vrot.slane %v952_v29, 1 }
 0x28f   :  { %v937_v45 = vadd.f32 %v936_v39, %v935_v37 }
 0x290   :  { %v954_v30 = vadd.f32 %v953_v21, %v952_v29 }
 0x291   :  { %v1134_v49 = vadd.f32 -1.0, %v937_v45  ;;  %vm955_vm13 = vcmp.gt.f32.partialorder %v937_v45, 1.0 }
 0x292   :  { %v959_v32 = vmax.f32 %v954_v30, 1.0  ;;  %v956_v54 = vsel %vm955_vm13, %v924_v13, %v903_v3  ;;  %v957_v51 = vsel %vm955_vm13, %v904_v11, %v924_v13 }
 0x294   :  { %1180 = vrcp.f32 %v959_v32  ;;  %v971_v41 = vand.u32 2147483648, %v959_v32  ;;  %v969_v46 = vand.u32 2147483647, %v959_v32  ;;  %vm965_vm10 = vweird.f32 %v959_v32 }
 0x296   :  { %v972_v48 = vor.u32 1.1754944e-38, %v971_v41  ;;  %vm970_vm12 = vcmp.eq.f32.partialorder %v969_v46, 8.507059e+37 }
 0x29a   :  { %v1181_v38 = vpop.eup %1180 }
 0x29b   :  { %v961_v40 = vmul.f32 %v1181_v38, %v959_v32  ;;  %vm966_vm9 = vweird.f32 %v1181_v38 }
 0x29c   :  { %vm967_vm11 = vmor %vm965_vm10, %vm966_vm9  ;;  %vm1069_vm9 = vcmask 130048  }
 0x29d   :  { %v962_v31 = vsub.f32 1.0, %v961_v40 }
 0x29f   :  { %v963_v43 = vmul.f32 %v1181_v38, %v962_v31 }
 0x2a1   :  { %v964_v47 = vadd.f32 %v1181_v38, %v963_v43 }
 0x2a3   :  { %v968_v44 = vsel %vm967_vm11, %v1181_v38, %v964_v47 }
 0x2a4   :  { %v973_v50 = vsel %vm970_vm12, %v972_v48, %v968_v44 }
 0x2a5   :  { %v974_v52 = vmul.f32 %v1134_v49, %v973_v50 }
 0x2a7   :  { %v975_v53 = vadd.f32 %v974_v52, %v924_v13 }
 0x2a9   :  { %v976_v42 = vmax.f32 %v956_v54, %v975_v53 }
 0x2ab   :  { %v977_v55 = vmin.f32 %v957_v51, %v976_v42 }
 0x2ad   :  { %v978_v56 = vsub.f32 %v1382_v33, %v977_v55  ;;  %v979_v57 = vsub.f32 %v1384_v34, %v977_v55 }
 0x2af   :  { %v980_v59 = vmax.f32 %v978_v56, 0.0  ;;  %v981_v61 = vmax.f32 %v979_v57, 0.0  ;;  %vm991_vm14 = vcmp.gt.f32.partialorder %v978_v56, 0.0  ;;  %vm992_vm15 = vcmp.gt.f32.partialorder %v979_v57, 0.0 }
 0x2b0   :  { %vm993_vm0 = vcmp.lt.f32.partialorder %v978_v56, 1.0  ;;  %vm994_vm1 = vcmp.lt.f32.partialorder %v979_v57, 1.0 }
 0x2b1   :  { %vm995_vm2 = vmand %vm991_vm14, %vm993_vm0  ;;  %v982_v63 = vmin.f32 %v980_v59, 1.0  ;;  %v983_v0 = vmin.f32 %v981_v61, 1.0 }
 0x2b2   :  { %vm996_vm3 = vmand %vm992_vm15, %vm994_vm1  ;;  %v1135_v62 = vsel %vm995_vm2, 1.0, %v1211_v25 }
 0x2b3   :  { %v1136_v1 = vsel %vm996_vm3, 1.0, %v1211_v25  ;;  %v984_v2 = vadd.f32 %v983_v0, %v982_v63 }
 0x2b4   :  { %v1001_v58 = vadd.f32 %v1136_v1, %v1135_v62 }
 0x2b5   :  { %v985_v7 = vrot.slane %v984_v2, 4 }
 0x2b6   :  { %v1002_v60 = vrot.slane %v1001_v58, 4 }
 0x2b7   :  { %v986_v10 = vadd.f32 %v985_v7, %v984_v2 }
 0x2b8   :  { %v1003_v4 = vadd.f32 %v1002_v60, %v1001_v58 }
 0x2b9   :  { %v987_v11 = vrot.slane %v986_v10, 2 }
 0x2ba   :  { %v1004_v6 = vrot.slane %v1003_v4, 2 }
 0x2bb   :  { %v988_v13 = vadd.f32 %v987_v11, %v986_v10 }
 0x2bc   :  { %v1005_v8 = vadd.f32 %v1004_v6, %v1003_v4 }
 0x2bd   :  { %v989_v16 = vrot.slane %v988_v13, 1 }
 0x2be   :  { %v1006_v9 = vrot.slane %v1005_v8, 1 }
 0x2bf   :  { %v990_v25 = vadd.f32 %v989_v16, %v988_v13 }
 0x2c0   :  { %v1007_v3 = vadd.f32 %v1006_v9, %v1005_v8 }
 0x2c1   :  { %v1137_v22 = vadd.f32 -1.0, %v990_v25  ;;  %vm1008_vm8 = vcmp.gt.f32.partialorder %v990_v25, 1.0 }
 0x2c2   :  { %v1012_v5 = vmax.f32 %v1007_v3, 1.0  ;;  %v1009_v29 = vsel %vm1008_vm8, %v977_v55, %v956_v54  ;;  %v1010_v23 = vsel %vm1008_vm8, %v957_v51, %v977_v55 }
 0x2c4   :  { %1182 = vrcp.f32 %v1012_v5  ;;  %v1024_v19 = vand.u32 2147483648, %v1012_v5  ;;  %v1022_v35 = vand.u32 2147483647, %v1012_v5  ;;  %vm1018_vm5 = vweird.f32 %v1012_v5 }
 0x2c6   :  { %v1025_v20 = vor.u32 1.1754944e-38, %v1024_v19  ;;  %vm1023_vm7 = vcmp.eq.f32.partialorder %v1022_v35, 8.507059e+37 }
 0x2ca   :  { %v1183_v15 = vpop.eup %1182 }
 0x2cb   :  { %v1014_v17 = vmul.f32 %v1183_v15, %v1012_v5  ;;  %vm1019_vm4 = vweird.f32 %v1183_v15 }
 0x2cc   :  { %vm1020_vm6 = vmor %vm1018_vm5, %vm1019_vm4 }
 0x2cd   :  { %v1015_v18 = vsub.f32 1.0, %v1014_v17 }
 0x2cf   :  { %v1016_v12 = vmul.f32 %v1183_v15, %v1015_v18 }
 0x2d1   :  { %v1017_v14 = vadd.f32 %v1183_v15, %v1016_v12 }
 0x2d3   :  { %v1021_v24 = vsel %vm1020_vm6, %v1183_v15, %v1017_v14 }
 0x2d4   :  { %v1026_v26 = vsel %vm1023_vm7, %v1025_v20, %v1021_v24 }
 0x2d5   :  { %v1027_v27 = vmul.f32 %v1137_v22, %v1026_v26 }
 0x2d7   :  { %v1028_v28 = vadd.f32 %v1027_v27, %v977_v55 }
 0x2d9   :  { %v1029_v21 = vmax.f32 %v1009_v29, %v1028_v28 }
 0x2db   :  { %v1030_v30 = vmin.f32 %v1010_v23, %v1029_v21 }
 0x2dd   :  { %v1031_v32 = vsub.f32 %v1382_v33, %v1030_v30  ;;  %v1032_v38 = vsub.f32 %v1384_v34, %v1030_v30 }
 0x2df   :  { %v1033_v36 = vmax.f32 %v1031_v32, 0.0  ;;  %v1034_v39 = vmax.f32 %v1032_v38, 0.0 }
 0x2e1   :  { %v1035_v37 = vmin.f32 %v1033_v36, 1.0  ;;  %v1036_v40 = vmin.f32 %v1034_v39, 1.0 }
 0x2e3   :  { %1037 = vxpose.xlu2.b32.start [1/2] (short) %v1035_v37, 128 }
 0x2eb   :  { %1038 = vxpose.xlu2.b32.end [2/2] (short) %v1036_v40, 128 }
 0x37c   :  { %v1053_v31 = vpop.trf.xlu2 }
 0x37d   :  { %1070 = vst.msk [vmem:[#allocation2] sm:$0xff] %vm1069_vm9, %v1053_v31 }
 0x384   :  { %v1054_v41 = vpop.trf.xlu2 }
 0x385   :  { %1071 = vst.msk [vmem:[#allocation2 + $0x8] sm:$0xff] %vm1069_vm9, %v1054_v41 }
 0x38c   :  { %v1055_v45 = vpop.trf.xlu2 }
 0x38d   :  { %1072 = vst.msk [vmem:[#allocation2 + $0x10] sm:$0xff] %vm1069_vm9, %v1055_v45 }
 0x394   :  { %v1056_v43 = vpop.trf.xlu2 }
 0x395   :  { %1073 = vst.msk [vmem:[#allocation2 + $0x18] sm:$0xff] %vm1069_vm9, %v1056_v43 }
 0x39c   :  { %v1057_v33 = vpop.trf.xlu2 }
 0x39d   :  { %1074 = vst.msk [vmem:[#allocation2 + $0x20] sm:$0xff] %vm1069_vm9, %v1057_v33 }
 0x3a4   :  { %v1058_v34 = vpop.trf.xlu2 }
 0x3a5   :  { %1075 = vst.msk [vmem:[#allocation2 + $0x28] sm:$0xff] %vm1069_vm9, %v1058_v34 }
 0x3ac   :  { %v1059_v46 = vpop.trf.xlu2 }
 0x3ad   :  { %1076 = vst.msk [vmem:[#allocation2 + $0x30] sm:$0xff] %vm1069_vm9, %v1059_v46 }
 0x3b4   :  { %v1060_v47 = vpop.trf.xlu2 }
 0x3b5   :  { %1077 = vst.msk [vmem:[#allocation2 + $0x38] sm:$0xff] %vm1069_vm9, %v1060_v47 }
 0x3bc   :  { %v1061_v48 = vpop.trf.xlu2 }
 0x3bd   :  { %1078 = vst.msk [vmem:[#allocation2 + $0x40] sm:$0xff] %vm1069_vm9, %v1061_v48 }
 0x3c4   :  { %v1062_v49 = vpop.trf.xlu2 }
 0x3c5   :  { %1079 = vst.msk [vmem:[#allocation2 + $0x48] sm:$0xff] %vm1069_vm9, %v1062_v49 }
 0x3cc   :  { %v1063_v44 = vpop.trf.xlu2 }
 0x3cd   :  { %1080 = vst.msk [vmem:[#allocation2 + $0x50] sm:$0xff] %vm1069_vm9, %v1063_v44 }
 0x3d4   :  { %v1064_v50 = vpop.trf.xlu2 }
 0x3d5   :  { %1081 = vst.msk [vmem:[#allocation2 + $0x58] sm:$0xff] %vm1069_vm9, %v1064_v50 }
 0x3dc   :  { %v1065_v52 = vpop.trf.xlu2 }
 0x3dd   :  { %1082 = vst.msk [vmem:[#allocation2 + $0x60] sm:$0xff] %vm1069_vm9, %v1065_v52 }
 0x3e4   :  { %v1066_v53 = vpop.trf.xlu2 }
 0x3e5   :  { %1083 = vst.msk [vmem:[#allocation2 + $0x68] sm:$0xff] %vm1069_vm9, %v1066_v53 }
 0x3ec   :  { %v1067_v54 = vpop.trf.xlu2 }
 0x3ed   :  { %1084 = vst.msk [vmem:[#allocation2 + $0x70] sm:$0xff] %vm1069_vm9, %v1067_v54 }
 0x3f4   :  { %v1068_v42 = vpop.trf.xlu2 }
 0x3f5   :  { %1085 = vst.msk [vmem:[#allocation2 + $0x78] sm:$0xff] %vm1069_vm9, %v1068_v42 }
 0x3f6   :  { %1089 = vsyncadd [#allocation3], 1920  ;;  %s1092_s16 = sshll.u32 %s1503_s2, 4  ;;  %s1212_s17 = smov [#allocation2]   ;;  %s1093_s16 = int_to_ptr.hbm [resolvable:$true] %s1092_s16 }
 0x3f7   :  { %s1090_s18 = sshll.u32 %s1212_s17, 4  ;;  %s1213_s19 = smov 128   ;;  %s1091_s18 = int_to_ptr.vmem [resolvable:$true] %s1090_s18 }
 0x3f8   :  { %s1214_s20 = smov 8  }
 0x3f9   :  { %1098 = dma.vmem_to_hbm [thread:$0]  %s1091_s18, 128, %s1093_s16, [#allocation3], %s1213_s19, %s1213_s19, %s1214_s20  }
 0x3fa   :  { %1208 = dma.done.wait [#allocation3], 2048  }
 0x3fb   :  { %1209 = vsyncadd [#allocation3], 4294965248 }
 0x3fc   :  { %1103 = vsyncpa [#allocation3], 1 }

</bundles_post_ra>
